<compile_context>
chip_gen: v7x
topology: tpu7x:2x2x1
jax: 0.10.0
libtpu: 0.0.40
codegen_flags: <defaults>
</compile_context>

<pallas_src>
import functools

import jax
import jax.numpy as jnp
from jax import lax
from jax.experimental import pallas as pl
from jax.experimental.pallas import tpu as pltpu


def double_conv_res_kernel(x_ref, w1_ref, b1_ref, w2_ref, b2_ref, o_ref, *, img_rows):
    # x_ref:  (B*H, W*C)    B images stacked along sublanes, lane-dense rows, f32
    # w*_ref: (3*W*C, W*C)  K-packed banded conv weights, bf16 (BN scale folded)
    # b*_ref: (1, W*C)      folded conv-bias + BN bias, tiled over W, f32
    # o_ref:  (B*H, W*C)
    M = x_ref.shape[0]
    x = x_ref[...].astype(jnp.float32)                               # (M, W*C)

    # Per-image boundary masks, hoisted once (shared by both convs).
    row = lax.broadcasted_iota(jnp.int32, (M, 1), 0) % img_rows
    first_row = row == 0
    last_row = row == img_rows - 1

    def conv3x3(a_f32, band_ref):
        # Row shifts for the 3 kernel-row offsets; H zero padding (and image
        # separation inside the slab) via the hoisted row masks.
        up = jnp.where(first_row, 0.0, pltpu.roll(a_f32, 1, axis=0))        # a[h-1]
        down = jnp.where(last_row, 0.0, pltpu.roll(a_f32, M - 1, axis=0))   # a[h+1]
        lhs = jnp.concatenate([up, a_f32, down], axis=1)                    # (M, 3*W*C)
        return jnp.dot(lhs.astype(jnp.bfloat16), band_ref[...],
                       preferred_element_type=jnp.float32)

    y1 = jnp.maximum(conv3x3(x, w1_ref) + b1_ref[...], 0.0)    # conv1 + BN1 + ReLU
    y2 = conv3x3(y1, w2_ref) + b2_ref[...]                     # conv2 + BN2
    o_ref[...] = jnp.maximum(y2 + x, 0.0).astype(o_ref.dtype)  # + identity, ReLU


def _band_weights(w_khwio, width):
    """(3,3,Cin,Cout) -> (3*width*Cin, width*Cout) K-packed block-banded weight.

    Rows [dy*width*Cin : (dy+1)*width*Cin] hold B[dy] with
    B[dy][wi*Cin+ci, wo*Cout+co] = w[dy, wi-wo+1, ci, co]; taps falling outside
    0..width-1 are dropped, which implements the conv's zero padding along W.
    The kernel matches this with [a[h-1], a[h], a[h+1]] concatenated along lanes.
    """
    kH, kW, cin, cout = w_khwio.shape
    bands = []
    for dy in range(kH):
        m = jnp.zeros((width * cin, width * cout), w_khwio.dtype)
        for dx in range(kW):
            m = m + jnp.kron(jnp.eye(width, width, k=1 - dx, dtype=w_khwio.dtype),
                             w_khwio[dy, dx])
        bands.append(m)
    return jnp.concatenate(bands, axis=0)


def _pick_batch_block(n, h, target_rows=256):
    """Largest divisor B of n with B*h <= target_rows, keeping >= 2 grid steps
    (both v7x TensorCores) whenever n > 1."""
    best = 1
    for b in range(1, n + 1):
        if n % b:
            continue
        if b > 1 and b * h > target_rows:
            continue
        if n > 1 and n // b < 2:
            continue
        best = b
    return best


def double_conv_res(x_nhwc, w1, s1, b1, w2, s2, b2, *, batch_block=None):
    """x_nhwc: (N,H,W,C); w*: (3,3,Cin,Cout); s*/b*: (Cout,) folded BN scale/bias."""
    N, H, W, C = x_nhwc.shape
    cout = w1.shape[-1]
    assert C == cout, "identity residual requires c_in == c_out (no downsample)"
    WC = W * C
    assert WC % 128 == 0, "W*C must be a multiple of 128 for lane-dense packing"

    B = _pick_batch_block(N, H) if batch_block is None else batch_block
    assert N % B == 0
    BH = B * H
    assert BH % 8 == 0, "batch-block rows must be a multiple of the 8-sublane tile"
    grid = (N // B,)

    # Fold BN scale into the conv weights; build K-packed banded matrices (bf16).
    # (Folding into bf16 loses a little precision if the BN scale is large; keep
    #  the scale as an f32 post-dot multiply if tighter than ~5e-2 is needed.)
    band1 = _band_weights(w1 * s1, W).astype(jnp.bfloat16)          # (3*W*C, W*C)
    band2 = _band_weights(w2 * s2, W).astype(jnp.bfloat16)
    bias1 = jnp.tile(b1, W).reshape(1, WC).astype(jnp.float32)
    bias2 = jnp.tile(b2, W).reshape(1, WC).astype(jnp.float32)

    x2d = x_nhwc.reshape(N * H, WC)                                  # lane-dense rows

    # Grid-invariant operands: constant index_map + single buffer.
    def const_spec(shape):
        return pl.BlockSpec(shape, lambda n: (0, 0), pipeline_mode=pl.Buffered(1))

    # VMEM budget: in/out slabs double-buffered, bands/biases single-buffered.
    itemsize = x2d.dtype.itemsize
    block_bytes = (2 * BH * WC * itemsize          # input slab, 2 buffers
                   + 2 * BH * WC * itemsize        # output slab, 2 buffers
                   + band1.size * 2 + band2.size * 2
                   + bias1.size * 4 + bias2.size * 4)
    vmem_limit = int(min(100 << 20, max(32 << 20, 2 * block_bytes)))

    grid_spec = pltpu.PrefetchScalarGridSpec(
        num_scalar_prefetch=0,
        grid=grid,
        in_specs=[
            pl.BlockSpec((BH, WC), lambda n: (n, 0)),
            const_spec((3 * WC, WC)),
            const_spec((1, WC)),
            const_spec((3 * WC, WC)),
            const_spec((1, WC)),
        ],
        out_specs=pl.BlockSpec((BH, WC), lambda n: (n, 0)),
    )
    out2d = pl.pallas_call(
        functools.partial(double_conv_res_kernel, img_rows=H),
        out_shape=jax.ShapeDtypeStruct((N * H, WC), x_nhwc.dtype),
        grid_spec=grid_spec,
        compiler_params=pltpu.CompilerParams(
            dimension_semantics=("parallel",),
            vmem_limit_bytes=vmem_limit),
    )(x2d, band1, bias1, band2, bias2)
    return out2d.reshape(N, H, W, cout)


def ref_forward_nchw(x, w1_oihw, cb1, g1, be1, m1, v1,
                     w2_oihw, cb2, g2, be2, m2, v2, eps=1e-5):
    """Pure-JAX reference matching the PyTorch forward (eval-mode BN)."""
    def conv(x, w, b):
        y = lax.conv_general_dilated(
            x, w, window_strides=(1, 1), padding=((1, 1), (1, 1)),
            dimension_numbers=('NCHW', 'OIHW', 'NCHW'))
        return y + b[None, :, None, None]

    def bn(x, g, be, m, v):
        return ((x - m[None, :, None, None])
                / jnp.sqrt(v[None, :, None, None] + eps)
                * g[None, :, None, None] + be[None, :, None, None])

    y = jax.nn.relu(bn(conv(x, w1_oihw, cb1), g1, be1, m1, v1))
    y = bn(conv(y, w2_oihw, cb2), g2, be2, m2, v2)
    return jax.nn.relu(y + x)


if __name__ == "__main__":
    key = jax.random.PRNGKey(0)
    # c_in == c_out; W*C = 128 -> fully lane-dense rows.
    # N=16 -> batch-block B=8 (M = B*H = 128 rows per step), grid=(2,) for v7x.
    N, C, H, W = 16, 8, 16, 16
    eps = 1e-5

    ks = jax.random.split(key, 12)
    x_nchw = jax.random.normal(ks[0], (N, C, H, W), jnp.float32)

    # conv1 / bn1 params (PyTorch shapes)
    w1_oihw = jax.random.normal(ks[1], (C, C, 3, 3), jnp.float32) * 0.1
    cb1 = jax.random.normal(ks[2], (C,), jnp.float32) * 0.1
    g1 = 1.0 + 0.1 * jax.random.normal(ks[3], (C,), jnp.float32)
    be1 = 0.1 * jax.random.normal(ks[4], (C,), jnp.float32)
    m1 = 0.1 * jax.random.normal(ks[5], (C,), jnp.float32)
    v1 = 0.5 + jax.random.uniform(ks[6], (C,), jnp.float32)

    # conv2 / bn2 params
    w2_oihw = jax.random.normal(ks[7], (C, C, 3, 3), jnp.float32) * 0.1
    cb2 = jax.random.normal(ks[8], (C,), jnp.float32) * 0.1
    g2 = 1.0 + 0.1 * jax.random.normal(ks[9], (C,), jnp.float32)
    be2 = 0.1 * jax.random.normal(ks[10], (C,), jnp.float32)
    m2 = 0.1 * jax.random.normal(ks[11], (C,), jnp.float32)
    v2 = 0.5 + jax.random.uniform(jax.random.fold_in(key, 99), (C,), jnp.float32)

    # fold conv bias + inference-mode BN into per-channel scale / bias
    s1 = g1 / jnp.sqrt(v1 + eps)
    b1 = (cb1 - m1) * s1 + be1
    s2 = g2 / jnp.sqrt(v2 + eps)
    b2 = (cb2 - m2) * s2 + be2

    # kernel-layout params: NHWC activations, (kH,kW,Cin,Cout) weights
    x_nhwc = jnp.transpose(x_nchw, (0, 2, 3, 1))
    w1_k = jnp.transpose(w1_oihw, (2, 3, 1, 0))
    w2_k = jnp.transpose(w2_oihw, (2, 3, 1, 0))

    out_nhwc = double_conv_res(x_nhwc, w1_k, s1, b1, w2_k, s2, b2)
    out_nhwc = jax.block_until_ready(out_nhwc)
    out_nchw = jnp.transpose(out_nhwc, (0, 3, 1, 2))

    ref = ref_forward_nchw(x_nchw, w1_oihw, cb1, g1, be1, m1, v1,
                           w2_oihw, cb2, g2, be2, m2, v2, eps)

    # bf16 MXU operands (f32 accumulation) -> correspondingly relaxed tolerance.
    max_err = float(jnp.max(jnp.abs(out_nchw - ref)))
    assert jnp.allclose(out_nchw, ref, atol=5e-2, rtol=5e-2), max_err
    print("KERNEL_OK")
</pallas_src>

<mosaic_0001>
module attributes {stable_mosaic.version = 11 : i64} {
  func.func @double_conv_res_kernel(%arg0: i32, %arg1: memref<128x128xf32, #tpu.memory_space<vmem>>, %arg2: memref<384x128xbf16, #tpu.memory_space<vmem>>, %arg3: memref<1x128xf32, #tpu.memory_space<vmem>>, %arg4: memref<384x128xbf16, #tpu.memory_space<vmem>>, %arg5: memref<1x128xf32, #tpu.memory_space<vmem>>, %arg6: memref<128x128xf32, #tpu.memory_space<vmem>>) attributes {dimension_semantics = [#tpu.dimension_semantics<parallel>], iteration_bounds = array<i64: 2>, scalar_prefetch = 0 : i64, scratch_operands = 0 : i64, tpu.core_type = #tpu.core_type<tc>, window_params = [{transform_indices = @transform_0, window_bounds = array<i64: 128, 128>}, {pipeline_mode = #tpu.pipeline_mode<synchronous>, transform_indices = @transform_1, window_bounds = array<i64: 384, 128>}, {pipeline_mode = #tpu.pipeline_mode<synchronous>, transform_indices = @transform_2, window_bounds = array<i64: 1, 128>}, {pipeline_mode = #tpu.pipeline_mode<synchronous>, transform_indices = @transform_3, window_bounds = array<i64: 384, 128>}, {pipeline_mode = #tpu.pipeline_mode<synchronous>, transform_indices = @transform_4, window_bounds = array<i64: 1, 128>}, {transform_indices = @transform_5, window_bounds = array<i64: 128, 128>}]} {
    %c0 = arith.constant 0 : index
    %c0_0 = arith.constant 0 : index
    %0 = vector.load %arg1[%c0, %c0_0] : memref<128x128xf32, #tpu.memory_space<vmem>>, vector<128x128xf32>
    %1 = tpu.iota {dimensions = array<i32: 0>} : vector<128x1xi32>
    %c16_i32 = arith.constant 16 : i32
    %c0_i32 = arith.constant 0 : i32
    %2 = arith.cmpi eq, %c16_i32, %c0_i32 : i32
    %c1_i32 = arith.constant 1 : i32
    %3 = arith.select %2, %c1_i32, %c16_i32 : i32
    %4 = vector.broadcast %3 : i32 to vector<128x1xi32>
    %5 = arith.remsi %1, %4 : vector<128x1xi32>
    %c0_i32_1 = arith.constant 0 : i32
    %6 = vector.broadcast %c0_i32_1 : i32 to vector<128x1xi32>
    %7 = arith.cmpi ne, %5, %6 : vector<128x1xi32>
    %c0_i32_2 = arith.constant 0 : i32
    %8 = vector.broadcast %c0_i32_2 : i32 to vector<128x1xi32>
    %9 = arith.cmpi slt, %5, %8 : vector<128x1xi32>
    %c0_i32_3 = arith.constant 0 : i32
    %10 = arith.cmpi slt, %3, %c0_i32_3 : i32
    %11 = vector.broadcast %10 : i1 to vector<128x1xi1>
    %12 = vector.broadcast %11 : vector<128x1xi1> to vector<128x1xi1>
    %13 = arith.xori %9, %12 : vector<128x1xi1>
    %14 = arith.andi %13, %7 : vector<128x1xi1>
    %15 = vector.broadcast %3 : i32 to vector<128x1xi32>
    %16 = arith.addi %5, %15 : vector<128x1xi32>
    %17 = arith.select %14, %16, %5 : vector<128x1xi1>, vector<128x1xi32>
    %c0_i32_4 = arith.constant 0 : i32
    %18 = vector.broadcast %c0_i32_4 : i32 to vector<128x1xi32>
    %19 = arith.cmpi eq, %17, %18 : vector<128x1xi32>
    %c15_i32 = arith.constant 15 : i32
    %20 = vector.broadcast %c15_i32 : i32 to vector<128x1xi32>
    %21 = arith.cmpi eq, %17, %20 : vector<128x1xi32>
    %c1_i32_5 = arith.constant 1 : i32
    %22 = tpu.dynamic_rotate %0 by %c1_i32_5 dim 0 : vector<128x128xf32>, i32 -> vector<128x128xf32>
    %cst = arith.constant 0.000000e+00 : f32
    %23 = vector.shape_cast %19 : vector<128x1xi1> to vector<128x1xi1>
    %24 = vector.broadcast %23 : vector<128x1xi1> to vector<128x128xi1>
    %25 = vector.broadcast %cst : f32 to vector<128x128xf32>
    %26 = arith.select %24, %25, %22 : vector<128x128xi1>, vector<128x128xf32>
    %c127_i32 = arith.constant 127 : i32
    %27 = tpu.dynamic_rotate %0 by %c127_i32 dim 0 : vector<128x128xf32>, i32 -> vector<128x128xf32>
    %cst_6 = arith.constant 0.000000e+00 : f32
    %28 = vector.shape_cast %21 : vector<128x1xi1> to vector<128x1xi1>
    %29 = vector.broadcast %28 : vector<128x1xi1> to vector<128x128xi1>
    %30 = vector.broadcast %cst_6 : f32 to vector<128x128xf32>
    %31 = arith.select %29, %30, %27 : vector<128x128xi1>, vector<128x128xf32>
    %32 = tpu.concatenate %26, %0, %31 in 1 : vector<128x128xf32>, vector<128x128xf32>, vector<128x128xf32> -> vector<128x384xf32>
    %33 = arith.truncf %32 : vector<128x384xf32> to vector<128x384xbf16>
    %c0_7 = arith.constant 0 : index
    %c0_8 = arith.constant 0 : index
    %34 = vector.load %arg2[%c0_7, %c0_8] : memref<384x128xbf16, #tpu.memory_space<vmem>>, vector<384x128xbf16>
    %cst_9 = arith.constant dense<0.000000e+00> : vector<128x128xf32>
    %35 = tpu.matmul %33, %34, %cst_9 {dimension_numbers = #tpu.dot_dimension_numbers<[1], [0], [0], [1], [0, 0, 1, 1], [], []>} : vector<128x384xbf16>, vector<384x128xbf16>, vector<128x128xf32> -> vector<128x128xf32>
    %c0_10 = arith.constant 0 : index
    %c0_11 = arith.constant 0 : index
    %36 = vector.load %arg3[%c0_10, %c0_11] : memref<1x128xf32, #tpu.memory_space<vmem>>, vector<1x128xf32>
    %37 = vector.broadcast %36 : vector<1x128xf32> to vector<128x128xf32>
    %38 = arith.addf %35, %37 : vector<128x128xf32>
    %cst_12 = arith.constant 0.000000e+00 : f32
    %39 = vector.broadcast %cst_12 : f32 to vector<128x128xf32>
    %40 = arith.maximumf %38, %39 : vector<128x128xf32>
    %c1_i32_13 = arith.constant 1 : i32
    %41 = tpu.dynamic_rotate %40 by %c1_i32_13 dim 0 : vector<128x128xf32>, i32 -> vector<128x128xf32>
    %cst_14 = arith.constant 0.000000e+00 : f32
    %42 = vector.shape_cast %19 : vector<128x1xi1> to vector<128x1xi1>
    %43 = vector.broadcast %42 : vector<128x1xi1> to vector<128x128xi1>
    %44 = vector.broadcast %cst_14 : f32 to vector<128x128xf32>
    %45 = arith.select %43, %44, %41 : vector<128x128xi1>, vector<128x128xf32>
    %c127_i32_15 = arith.constant 127 : i32
    %46 = tpu.dynamic_rotate %40 by %c127_i32_15 dim 0 : vector<128x128xf32>, i32 -> vector<128x128xf32>
    %cst_16 = arith.constant 0.000000e+00 : f32
    %47 = vector.shape_cast %21 : vector<128x1xi1> to vector<128x1xi1>
    %48 = vector.broadcast %47 : vector<128x1xi1> to vector<128x128xi1>
    %49 = vector.broadcast %cst_16 : f32 to vector<128x128xf32>
    %50 = arith.select %48, %49, %46 : vector<128x128xi1>, vector<128x128xf32>
    %51 = tpu.concatenate %45, %40, %50 in 1 : vector<128x128xf32>, vector<128x128xf32>, vector<128x128xf32> -> vector<128x384xf32>
    %52 = arith.truncf %51 : vector<128x384xf32> to vector<128x384xbf16>
    %c0_17 = arith.constant 0 : index
    %c0_18 = arith.constant 0 : index
    %53 = vector.load %arg4[%c0_17, %c0_18] : memref<384x128xbf16, #tpu.memory_space<vmem>>, vector<384x128xbf16>
    %cst_19 = arith.constant dense<0.000000e+00> : vector<128x128xf32>
    %54 = tpu.matmul %52, %53, %cst_19 {dimension_numbers = #tpu.dot_dimension_numbers<[1], [0], [0], [1], [0, 0, 1, 1], [], []>} : vector<128x384xbf16>, vector<384x128xbf16>, vector<128x128xf32> -> vector<128x128xf32>
    %c0_20 = arith.constant 0 : index
    %c0_21 = arith.constant 0 : index
    %55 = vector.load %arg5[%c0_20, %c0_21] : memref<1x128xf32, #tpu.memory_space<vmem>>, vector<1x128xf32>
    %56 = vector.broadcast %55 : vector<1x128xf32> to vector<128x128xf32>
    %57 = arith.addf %54, %56 : vector<128x128xf32>
    %58 = arith.addf %57, %0 : vector<128x128xf32>
    %cst_22 = arith.constant 0.000000e+00 : f32
    %59 = vector.broadcast %cst_22 : f32 to vector<128x128xf32>
    %60 = arith.maximumf %58, %59 : vector<128x128xf32>
    %c0_23 = arith.constant 0 : index
    %c0_24 = arith.constant 0 : index
    %61 = vector.load %arg6[%c0_23, %c0_24] : memref<128x128xf32, #tpu.memory_space<vmem>>, vector<128x128xf32>
    tpu.vector_store %arg6[%c0_23, %c0_24], %60 {strides = array<i32>} : memref<128x128xf32, #tpu.memory_space<vmem>>, vector<128x128xf32>,
    return
  }
  func.func @transform_0(%arg0: i32) -> (i32, i32) {
    %c0_i32 = arith.constant 0 : i32
    %c0_i32_0 = arith.constant 0 : i32
    return %arg0, %c0_i32 : i32, i32
  }
  func.func @transform_1(%arg0: i32) -> (i32, i32) {
    %c0_i32 = arith.constant 0 : i32
    %c0_i32_0 = arith.constant 0 : i32
    %c0_i32_1 = arith.constant 0 : i32
    return %c0_i32, %c0_i32_0 : i32, i32
  }
  func.func @transform_2(%arg0: i32) -> (i32, i32) {
    %c0_i32 = arith.constant 0 : i32
    %c0_i32_0 = arith.constant 0 : i32
    %c0_i32_1 = arith.constant 0 : i32
    return %c0_i32, %c0_i32_0 : i32, i32
  }
  func.func @transform_3(%arg0: i32) -> (i32, i32) {
    %c0_i32 = arith.constant 0 : i32
    %c0_i32_0 = arith.constant 0 : i32
    %c0_i32_1 = arith.constant 0 : i32
    return %c0_i32, %c0_i32_0 : i32, i32
  }
  func.func @transform_4(%arg0: i32) -> (i32, i32) {
    %c0_i32 = arith.constant 0 : i32
    %c0_i32_0 = arith.constant 0 : i32
    %c0_i32_1 = arith.constant 0 : i32
    return %c0_i32, %c0_i32_0 : i32, i32
  }
  func.func @transform_5(%arg0: i32) -> (i32, i32) {
    %c0_i32 = arith.constant 0 : i32
    %c0_i32_0 = arith.constant 0 : i32
    return %arg0, %c0_i32 : i32, i32
  }
}

</mosaic_0001>

<bundles_post_ra>
// kernel: tpu_custom_call.1
= control target key start
LH: loop header
LB: loop body
LE: loop exit
PB: predicated region body
PF: predicated region fallthrough
CT: control target
= control target key end

     0   :  { %10 = vsyncpa [#allocation3], 0  ;;  %s3508_s0 = inlined_call_operand.hbm [shape: f32[256,128], index: 0, kind: input, shape index: {}]   ;;  %s3509_s1 = inlined_call_operand.hbm [shape: bf16[384,128], index: 1, kind: input, shape index: {}]   ;;  %s3510_s2 = inlined_call_operand.vmem [shape: f32[1,128], index: 2, kind: input, shape index: {}]   ;;  %s3511_s3 = inlined_call_operand.hbm [shape: bf16[384,128], index: 3, kind: input, shape index: {}]   ;;  %s3512_s4 = inlined_call_operand.vmem [shape: f32[1,128], index: 4, kind: input, shape index: {}]   ;;  %s3513_s5 = inlined_call_operand.hbm [shape: f32[256,128], index: 5, kind: output, shape index: {}]  }
   0x1   :  { %12 = vsyncpa [#allocation3 + $0x1], 0 }
   0x2   :  { %13 = vsyncpa [#allocation6], 0 }
   0x3   :  { %14 = vsyncpa [#allocation4], 0 }
   0x4   :  { %16 = vsyncpa [#allocation4 + $0x1], 0  ;;  %s2569_s18 = smov 0   ;;  %s2571_s19 = smov 0  }
   0x5   :  { %s2573_s20 = smov 0   ;;  %s2575_s21 = smov 0  }
   0x6 LB: > { %s2590_s22 = sadd.s32 4294967295, %s2526_s21   ;;  %s1794_s23 = sadd.s32 4294967294, %s2526_s21   ;;  %s2526_s21 = sphi %s2575_s21, %s3606_s21   ;;  %s2522_s20 = sphi %s2573_s20, %s3605_s20   ;;  %s2518_s19 = sphi %s2571_s19, %s3604_s19   ;;  %s2514_s18 = sphi %s2569_s18, %s3603_s18  }
   0x7   : > { %p42_p0 = scmp.ne.s32.totalorder %s2518_s19, %s2514_s18  ;;  %p3514_p1 = scmp.eq.s32.totalorder %s2590_s22, 0 }
   0x8   : > { %p156_p3 = scmp.eq.s32.totalorder %s1794_s23, 1  ;;  %p1795_p5 = scmp.ge.s32.totalorder %s2526_s21, 1 }
   0x9   : > { %p2599_p4 = por %p3514_p1, %p42_p0  ;;  %p163_p7 = scmp.lt.s32.totalorder %s2526_s21, 3 }
   0xa   : > { %p2604_p6 = por %p156_p3, %p42_p0  ;;  %s2528_s27 = smov [#allocation5]  }
   0xb   : > { %s3521_s24 = scalar_select %p2599_p4, 1, 0 }
   0xc   : > { %s3522_s25 = scalar_select %p2604_p6, 1, 0 }
   0xd   : > { %p2609_p8 = pnand %p1795_p5, %p163_p7  ;;  %s175_s28 = sshll.u32 %s2528_s27, 4  ;;  %s2613_s28 = int_to_ptr.vmem [resolvable:$true] %s175_s28 }
   0xe   : > { %s2529_s30 = smov [#allocation7]   ;;  %s2370_s9 = scalar_lea.hbm %s3509_s1, 3072 }
   0xf   : > { %p2244_p9 = pneg %p2609_p8  ;;  %s191_s6 = sshll.u32 %s2529_s30, 4  ;;  %s2624_s6 = int_to_ptr.vmem [resolvable:$true] %s191_s6 }
  0x10   : > { %p2371_p12 = scmp.ne.s32.totalorder %s3509_s1, %s2370_s9  ;;  %p2377_p5 = scmp.lt.u32.totalorder %s2370_s9, %s3509_s1 }
  0x11   : > { %p2620_p11 = pnand %p2244_p9, %p3514_p1 }
  0x13   : > { %p2372_p13 = pneg %p2620_p11 }
  0x15   : > { %p2373_p0 = pnand %p2372_p13, %p2371_p12 }
  0x17   : > { %p2374_p3 = pneg %p2373_p0 }
  0x19   : > { %p2379_p7 = pnand %p2377_p5, %p2374_p3 }
  0x1b   : > { %2382 = shalt.err (!%p2379_p7)
}
  0x1c   : > { %s2383_s14 = scalar_lea.vmem %s2613_s28, 3072  ;;  %p2391_p2 = scmp.lt.s32.totalorder %s2613_s28, %s2613_s28 }
  0x1d   : > { %p2384_p9 = scmp.ne.s32.totalorder %s2613_s28, %s2383_s14  ;;  %p2392_p12 = scmp.lt.s32.totalorder %s2383_s14, %s2383_s14 }
  0x1f   : > { %p2386_p10 = pnand %p2384_p9, %p2372_p13  ;;  %p2393_p0 = por %p2392_p12, %p2391_p2 }
  0x21   : > { %p2387_p1 = pneg %p2386_p10 }
  0x23   : > { %p2394_p6 = pnand %p2393_p0, %p2387_p1 }
  0x25   : > { %2397 = shalt.err (!%p2394_p6)
}
  0x26   : > { %s2530_s15 = smov 64   ;;  %s2531_s16 = smov 4  }
  0x27   : > { %2247 = dma.hbm_to_vmem [thread:$0]  (!%p2620_p11), %s3509_s1, 3072, %s2613_s28, [#allocation6], %s2530_s15, %s2530_s15, %s2531_s16  }
  0x28   : > { %s2398_s7 = scalar_lea.hbm %s3511_s3, 3072 }
  0x29   : > { %p2399_p2 = scmp.ne.s32.totalorder %s3511_s3, %s2398_s7  ;;  %p2405_p10 = scmp.lt.u32.totalorder %s2398_s7, %s3511_s3 }
  0x2b   : > { %p2401_p1 = pnand %p2399_p2, %p2372_p13 }
  0x2d   : > { %p2402_p6 = pneg %p2401_p1 }
  0x2f   : > { %p2407_p3 = pnand %p2405_p10, %p2402_p6 }
  0x31   : > { %2410 = shalt.err (!%p2407_p3)
}
  0x32   : > { %s2411_s28 = scalar_lea.vmem %s2624_s6, 3072  ;;  %p2419_p12 = scmp.lt.s32.totalorder %s2624_s6, %s2624_s6 }
  0x33   : > { %p2412_p5 = scmp.ne.s32.totalorder %s2624_s6, %s2411_s28  ;;  %p2420_p0 = scmp.lt.s32.totalorder %s2411_s28, %s2411_s28 }
  0x35   : > { %p2414_p7 = pnand %p2412_p5, %p2372_p13  ;;  %p2421_p2 = por %p2420_p0, %p2419_p12 }
  0x37   : > { %p2415_p9 = pneg %p2414_p7 }
  0x39   : > { %p2422_p1 = pnand %p2421_p2, %p2415_p9 }
  0x3b   : > { %2425 = shalt.err (!%p2422_p1)
}
  0x3c   : > { %2250 = dma.hbm_to_vmem [thread:$0]  (!%p2620_p11), %s3511_s3, 3072, %s2624_s6, [#allocation6], %s2530_s15, %s2530_s15, %s2531_s16  }
  0x3d   : > { %s2679_s14 = sadd.s32 1, %s2526_s21   ;;  %s29_s29 = sadd.s32 1, %s2522_s20 }
  0x3e   : > { %s26_s17 = ssub.s32 %s2526_s21, %s2679_s14  ;;  %p36_p13 = scmp.ne.s32.totalorder %s2522_s20, %s2518_s19 }
  0x3f   : > { %p27_p6 = scmp.eq.s32.totalorder %s26_s17, 0  ;;  %p37_p10 = scmp.eq.s32.totalorder %s2526_s21, 0 }
  0x40   : > { %p3525_p3 = scmp.eq.s32.totalorder %s2590_s22, 1  ;;  %p2261_p7 = scmp.lt.s32.totalorder %s2526_s21, 2 }
  0x41   : > { %s2695_s27 = scalar_select %p27_p6, %s2522_s20, %s29_s29  }
  0x42   : > { %p2689_p5 = por %p3525_p3, %p36_p13  ;;  %p38_p9 = por %p37_p10, %p36_p13 }
  0x43   : > { %s208_s30 = sand.u32 1, %s2522_s20   ;;  %s1990_s6 = sshll.u32 %s2526_s21, 11 }
  0x44   : > { %s3526_s23 = scalar_select %p2689_p5, 1, 0 }
  0x45   : > { %s1799_s7 = sshll.u32 %s208_s30, 7  ;;  %s2702_s8 = scalar_lea.hbm %s3508_s0, %s1990_s6 }
  0x46   : > { %s212_s9 = scalar_lea.vmem [#allocation2], %s1799_s7  ;;  %p2706_p11 = pnand %p2261_p7, %p38_p9 }
  0x47   : > { %s219_s10 = sshll.u32 %s212_s9, 4  ;;  %s2710_s28 = scalar_lea.sflag [#allocation3], %s208_s30  ;;  %s2704_s10 = int_to_ptr.vmem [resolvable:$true] %s219_s10 }
  0x48   : > { %s2426_s12 = scalar_lea.hbm %s2702_s8, 2048  ;;  %p2428_p0 = pneg %p2706_p11 }
  0x49   : > { %p2427_p12 = scmp.ne.s32.totalorder %s2702_s8, %s2426_s12  ;;  %s2431_s17 = scalar_lea.hbm %s3508_s0, 4096 }
  0x4a   : > { %p2432_p13 = scmp.lt.u32.totalorder %s2702_s8, %s3508_s0  ;;  %p2433_p6 = scmp.lt.u32.totalorder %s2431_s17, %s2426_s12 }
  0x4b   : > { %p2429_p2 = pnand %p2428_p0, %p2427_p12  ;;  %p2435_p3 = scmp.lt.u32.totalorder %s2426_s12, %s2702_s8 }
  0x4c   : > { %p2434_p10 = por %p2433_p6, %p2432_p13 }
  0x4d   : > { %p2430_p1 = pneg %p2429_p2 }
  0x4e   : > { %p2436_p7 = por %p2435_p3, %p2434_p10 }
  0x50   : > { %p2437_p9 = pnand %p2436_p7, %p2430_p1 }
  0x52   : > { %2440 = shalt.err (!%p2437_p9)
}
  0x53   : > { %s2441_s30 = scalar_lea.vmem %s2704_s10, 2048  ;;  %s2532_s15 = smov [#allocation2]  }
  0x54   : > { %p2442_p12 = scmp.ne.s32.totalorder %s2704_s10, %s2441_s30  ;;  %s2446_s16 = sshll.u32 %s2532_s15, 4  ;;  %s2447_s16 = int_to_ptr.vmem [resolvable:$false] %s2446_s16 }
  0x55   : > { %s2448_s9 = scalar_lea.vmem %s2447_s16, 4096  ;;  %p2449_p4 = scmp.lt.s32.totalorder %s2704_s10, %s2447_s16 }
  0x56   : > { %p2444_p2 = pnand %p2442_p12, %p2428_p0  ;;  %p2450_p13 = scmp.lt.s32.totalorder %s2448_s9, %s2441_s30 }
  0x58   : > { %p2445_p5 = pneg %p2444_p2  ;;  %p2451_p6 = por %p2450_p13, %p2449_p4 }
  0x5a   : > { %p2452_p10 = pnand %p2451_p6, %p2445_p5 }
  0x5c   : > { %2455 = shalt.err (!%p2452_p10)
}
  0x5d   : > { %s2533_s12 = smov 128   ;;  %s2534_s13 = smov 8  }
  0x5e   : > { %2254 = dma.hbm_to_vmem [thread:$0]  (!%p2706_p11), %s2702_s8, 2048, %s2704_s10, %s2710_s28, %s2533_s12, %s2533_s12, %s2534_s13  }
  0x5f   : > { %231 = sbr.rel (%p2609_p8) target bundleno = 719 (0x2cf), region = 40  ;;  %s2741_s29 = sand.u32 (!%p2609_p8), 1, %s2518_s19  }
  0x60   : > { %s1803_s17 = sshll.u32 (!%p2609_p8), %s2741_s29, 7  ;;  %s234_s7 = scalar_lea.sflag (!%p2609_p8), [#allocation3], %s2741_s29 }
  0x61   : > { %s2747_s6 = scalar_lea.vmem (!%p2609_p8), [#allocation2], %s1803_s17  ;;  %p3528_p4 = scmp.ne.s32.totalorder (!%p2609_p8), %s3521_s24, 0 }
  0x66   : > { %2501 = dma.done.wait (%p3528_p4), %s234_s7, 2048  }
  0x67   : > { %2503 = vsyncadd (%p3528_p4), %s234_s7, 4294965248  ;;  %p3529_p5 = scmp.eq.s32.totalorder %s2590_s22, 0 }
  0x69   : > { %2505 = dma.done.wait (%p3529_p5), [#allocation6], 6144   ;;  %p3530_p8 = pmov %p3529_p5 }
  0x6a   : > { %v2306_v0 = vld [vmem:[#allocation5 + $0x40] sm:$0xff]   ;;  %v2308_v2 = vld [vmem:[#allocation5 + $0x48] sm:$0xff]   ;;  %v2311_v5 = vld [vmem:[#allocation5 + $0x50] sm:$0xff]   ;;  %v291_v10 = vlaneseq  ;;  %vm2535_vm5 = vmmov 1   ;;  %s3401_s11 = scalar_lea.vmem [#allocation8], %s1803_s17  ;;  %s1991_s28 = sshll.u32 %s2590_s22, 11 }
  0x6b   : > { %2507 = vsyncadd (%p3530_p8), [#allocation6], 4294961152  ;;  %v2307_v1 = vld [vmem:[#allocation5] sm:$0xff]   ;;  %2008 = vmatprep.subr.bf16.mxu0 %v2306_v0  ;;  %v2310_v4 = vld [vmem:[#allocation5 + $0x8] sm:$0xff]   ;;  %s1702_s30 = sshll.u32 %s3401_s11, 4  ;;  %s3460_s9 = scalar_lea.hbm %s3513_s5, %s1991_s28  ;;  %s3462_s30 = int_to_ptr.vmem [resolvable:$true] %s1702_s30 }
  0x6c   : > { %2009 = vmatpush3.bf16.msra.mxu0 %v2307_v1  ;;  %v2309_v3 = vld [vmem:[#allocation5 + $0x80] sm:$0xff]   ;;  %v2312_v6 = vld [vmem:[#allocation5 + $0x88] sm:$0xff]   ;;  %v2313_v7 = vld [vmem:[#allocation5 + $0x10] sm:$0xff]   ;;  %v2757_v14 = vshrl.u32 %v291_v10, 7  ;;  %s1689_s12 = scalar_lea.sflag [#allocation4], %s2741_s29  ;;  %s2456_s13 = scalar_lea.vmem %s3462_s30, 2048 }
  0x6d   : > { %2010 = vmatprep.subr.bf16.mxu0 %v2308_v2  ;;  %2168 = vmatprep.subr.bf16.mxu1 %v2309_v3  ;;  %v2314_v8 = vld [vmem:[#allocation5 + $0x58] sm:$0xff]   ;;  %v2315_v9 = vld [vmem:[#allocation5 + $0x90] sm:$0xff]   ;;  %v2317_v12 = vld [vmem:[#allocation5 + $0x60] sm:$0xff]   ;;  %p2457_p11 = scmp.ne.s32.totalorder %s3462_s30, %s2456_s13  ;;  %p3600_p0 = scmp.ne.s32.totalorder %s3526_s23, 0 }
  0x6e   : > { %2169 = vmatpush3.bf16.msra.mxu1 %v2309_v3  ;;  %v2316_v11 = vld [vmem:[#allocation5 + $0x18] sm:$0xff]   ;;  %v2319_v15 = vld [vmem:[#allocation5 + $0x20] sm:$0xff]   ;;  %v2320_v17 = vld [vmem:[#allocation5 + $0x68] sm:$0xff]   ;;  %v312_v18 = vand.u32 15, %v2757_v14  ;;  %vm548_vm0 = vcmp.lt.s32.totalorder %v2757_v14, 1  ;;  %v293_v20 = vadd.s32 8, %v2757_v14 }
  0x6f   : > { %2170 = vmatprep.subr.bf16.mxu1 %v2312_v6  ;;  %v2318_v13 = vld [vmem:[#allocation5 + $0x98] sm:$0xff]   ;;  %v2321_v16 = vld [vmem:[#allocation5 + $0xa0] sm:$0xff]   ;;  %v2322_v19 = vld [vmem:[#allocation5 + $0x28] sm:$0xff]   ;;  %v295_v22 = vadd.s32 24, %v2757_v14  ;;  %vm3517_vm1 = vcmp.lt.s32.totalorder %v2757_v14, 7  ;;  %v294_v25 = vadd.s32 16, %v2757_v14  ;;  %p2458_p1 = pnand %p2457_p11, %p3600_p0 }
  0x70   : > { %2011 = vmatpush3.bf16.msra.mxu0 %v2310_v4  ;;  %v2324_v21 = vld [vmem:[#allocation5 + $0xa8] sm:$0xff]   ;;  %v2323_v23 = vld [vmem:[#allocation5 + $0x70] sm:$0xff]   ;;  %v319_v27 = vand.u32 15, %v293_v20  ;;  %v2766_v28 = vld [vmem:[%s2747_s6] sm:$0xff]  ;;  %v297_v32 = vadd.s32 40, %v2757_v14  ;;  %v299_v33 = vadd.s32 56, %v2757_v14 }
  0x71   : > { %2012 = vmatprep.subr.bf16.mxu0 %v2311_v5  ;;  %v2325_v24 = vld [vmem:[#allocation5 + $0x30] sm:$0xff]   ;;  %v2769_v29 = vld [vmem:[%s2747_s6 + $0x8] sm:$0xff]  ;;  %v2772_v30 = vld [vmem:[%s2747_s6 + $0x78] sm:$0xff]  ;;  %v333_v31 = vand.u32 15, %v295_v22  ;;  %v532_v35 = vrot.slane %v2766_v28, 7  ;;  %v613_v40 = vrot.slane %v2766_v28, 1  ;;  %p2459_p3 = pneg %p2458_p1 }
  0x72   : > { %2171 = vmatpush3.bf16.msra.mxu1 %v2312_v6  ;;  %v2327_v26 = vld [vmem:[#allocation5 + $0xb0] sm:$0xff]   ;;  %v2326_v34 = vld [vmem:[#allocation5 + $0x78] sm:$0xff]   ;;  %v533_v36 = vrot.slane %v2769_v29, 7  ;;  %v695_v37 = vpack.c.bf16 %v2769_v29, %v2766_v28  ;;  %v547_v38 = vrot.slane %v2772_v30, 7  ;;  %v614_v41 = vrot.slane %v2769_v29, 1  ;;  %v2799_v47 = vld [vmem:[%s2747_s6 + $0x20] sm:$0xff] }
  0x73   : > { %2172 = vmatprep.subr.bf16.mxu1 %v2315_v9  ;;  %v2782_v39 = vld [vmem:[%s2747_s6 + $0x10] sm:$0xff]  ;;  %v326_v42 = vand.u32 15, %v294_v25  ;;  %vm2791_vm2 = vcmp.ne.s32.totalorder %v319_v27, 15  ;;  %v2796_v46 = vld [vmem:[%s2747_s6 + $0x18] sm:$0xff]  ;;  %v2802_v48 = vadd.s32 32, %v2757_v14  ;;  %v617_v54 = vrot.slane %v2799_v47, 1 }
  0x74   : > { %2013 = vmatpush3.bf16.msra.mxu0 %v2313_v7  ;;  %949 = vmatprep.mubr.bf16.mxu0 %v695_v37  ;;  %v563_v43 = vsel %vm548_vm0, %v532_v35, %v533_v36  ;;  %v615_v44 = vrot.slane %v2782_v39, 1  ;;  %v2328_v49 = vld [vmem:[#allocation5 + $0x38] sm:$0xff]   ;;  %v564_v50 = vsel %vm548_vm0, %v547_v38, %v532_v35  ;;  %v644_v52 = vsel %vm3517_vm1, %v613_v40, %v614_v41  ;;  %v2825_v58 = vld [vmem:[%s2747_s6 + $0x30] sm:$0xff]  ;;  %vm2830_vm6 = vmpackc.low %vm2791_vm2, %vm2535_vm5  ;;  %s2536_s22 = smov [#allocation8]  }
  0x75   : > { %2014 = vmatprep.subr.bf16.mxu0 %v2314_v8  ;;  %v2329_v51 = vld [vmem:[#allocation5 + $0xb8] sm:$0xff]   ;;  %v616_v53 = vrot.slane %v2796_v46, 1  ;;  %vm2814_vm3 = vcmp.ne.s32.totalorder %v312_v18, 0  ;;  %vm2820_vm4 = vcmp.ne.s32.totalorder %v333_v31, 15  ;;  %v347_v59 = vand.u32 15, %v297_v32  ;;  %v2839_v63 = vld [vmem:[%s2747_s6 + $0x28] sm:$0xff] }
  0x76   : > { %2173 = vmatpush3.bf16.msra.mxu1 %v2315_v9  ;;  %v643_v56 = vsel %vm3517_vm1, %v614_v41, %v615_v44  ;;  %vm2834_vm7 = vcmp.ne.s32.totalorder %v326_v42, 0  ;;  %v361_v0 = vand.u32 15, %v299_v33  ;;  %v301_v1 = vadd.s32 72, %v2757_v14  ;;  %vm2850_vm8 = vmpackc.low %vm2535_vm5, %vm2814_vm3  ;;  %v2883_v20 = vld [vmem:[%s2747_s6 + $0x50] sm:$0xff]  ;;  %v2330_v22 = vld [vmem:[#allocation7 + $0x80] sm:$0xff]   ;;  %s2460_s17 = sshll.u32 %s2536_s22, 4  ;;  %s2461_s17 = int_to_ptr.vmem [resolvable:$false] %s2460_s17 }
  0x77   : > { %2174 = vmatprep.subr.bf16.mxu1 %v2318_v13  ;;  %v1866_v61 = vpack.c.bf16 %v643_v56, %v644_v52  ;;  %v1834_v2 = vpack.c.bf16 %v563_v43, %v564_v50  ;;  %v641_v3 = vsel %vm3517_vm1, %v616_v53, %v617_v54  ;;  %v642_v4 = vsel %vm3517_vm1, %v615_v44, %v616_v53  ;;  %vm2890_vm11 = vmpackc.low %vm2820_vm4, %vm2535_vm5  ;;  %v2927_v41 = vld [vmem:[%s2747_s6 + $0x60] sm:$0xff]  ;;  %v2947_v52 = vld [vmem:[%s2747_s6 + $0x70] sm:$0xff]  ;;  %s2462_s7 = scalar_lea.vmem %s2461_s17, 4096  ;;  %p2463_p7 = scmp.lt.s32.totalorder %s3462_s30, %s2461_s17 }
  0x78   : > { %2015 = vmatpush3.bf16.msra.mxu0 %v2316_v11  ;;  %v618_v5 = vrot.slane %v2839_v63, 1  ;;  %v698_v7 = vpack.c.bf16 %v2796_v46, %v2782_v39  ;;  %v534_v8 = vrot.slane %v2782_v39, 7  ;;  %v535_v9 = vrot.slane %v2796_v46, 7  ;;  %v2860_v11 = vld [vmem:[%s2747_s6 + $0x38] sm:$0xff]  ;;  %vm2914_vm13 = vmpackc.low %vm2535_vm5, %vm2834_vm7  ;;  %v2952_v56 = vld [vmem:[%s2747_s6 + $0x68] sm:$0xff]  ;;  %p2464_p9 = scmp.lt.s32.totalorder %s2462_s7, %s2456_s13 }
  0x79   : > { %2016 = vmatprep.subr.bf16.mxu0 %v2317_v12  ;;  %v619_v10 = vrot.slane %v2825_v58, 1  ;;  %v2863_v12 = vld [vmem:[%s2747_s6 + $0x40] sm:$0xff]  ;;  %2184 = vmatprep.mubr.msk.bf16.mxu1 %vm2830_vm6, %v1866_v61  ;;  %vm2869_vm9 = vcmp.ne.s32.totalorder %v347_v59, 15  ;;  %vm2878_vm10 = vcmp.ne.s32.totalorder %v361_v0, 15  ;;  %v620_v25 = vrot.slane %v2860_v11, 1  ;;  %v2924_v39 = vld [vmem:[%s2747_s6 + $0x58] sm:$0xff] }
  0x7a   : > { %2175 = vmatpush3.bf16.msra.mxu1 %v2318_v13  ;;  %v640_v13 = vsel %vm3517_vm1, %v617_v54, %v618_v5  ;;  %v561_v27 = vsel %vm548_vm0, %v534_v8, %v535_v9  ;;  %v562_v31 = vsel %vm548_vm0, %v533_v36, %v534_v8  ;;  %vm2905_vm12 = vmpackc.low %vm2869_vm9, %vm2535_vm5  ;;  %v537_v35 = vrot.slane %v2839_v63, 7  ;;  %p2465_p12 = por %p2464_p9, %p2463_p7 }
  0x7b   : > { %2176 = vmatprep.subr.bf16.mxu1 %v2321_v16  ;;  %v639_v18 = vsel %vm3517_vm1, %v618_v5, %v619_v10  ;;  %v623_v36 = vrot.slane %v2883_v20, 1  ;;  %v536_v37 = vrot.slane %v2799_v47, 7  ;;  %v1838_v42 = vpack.c.bf16 %v561_v27, %v562_v31  ;;  %vm2959_vm15 = vmpackc.low %vm2878_vm10, %vm2535_vm5 }
  0x7c   : > { %2017 = vmatpush3.bf16.msra.mxu0 %v2319_v15  ;;  %v638_v44 = vsel %vm3517_vm1, %v619_v10, %v620_v25  ;;  %v701_v45 = vpack.c.bf16 %v2839_v63, %v2799_v47  ;;  %v340_v50 = vand.u32 15, %v2802_v48  ;;  %v305_v53 = vadd.s32 104, %v2757_v14  ;;  %p2466_p2 = pnand %p2465_p12, %p2459_p3 }
  0x7d   : > { %2018 = vmatprep.subr.bf16.mxu0 %v2320_v17  ;;  %v1870_v17 = vpack.c.bf16 %v641_v3, %v642_v4  ;;  %v298_v55 = vadd.s32 48, %v2757_v14  ;;  %v624_v59 = vrot.slane %v2924_v39, 1  ;;  %v625_v61 = vrot.slane %v2927_v41, 1 }
  0x7e   : > { %2177 = vmatpush3.bf16.msra.mxu1 %v2321_v16  ;;  %v2874_v16 = vld [vmem:[%s2747_s6 + $0x48] sm:$0xff]  ;;  %v559_v62 = vsel %vm548_vm0, %v536_v37, %v537_v35  ;;  %v560_v63 = vsel %vm548_vm0, %v535_v9, %v536_v37  ;;  %vm1994_vm3 = vcmp.ne.s32.totalorder %v340_v50, 0  ;;  %v403_v3 = vand.u32 15, %v305_v53 }
  0x7f   : > { %2178 = vmatprep.subr.bf16.mxu1 %v2324_v21  ;;  %v622_v33 = vrot.slane %v2874_v16, 1  ;;  %v704_v4 = vpack.c.bf16 %v2860_v11, %v2825_v58  ;;  %v354_v5 = vand.u32 15, %v298_v55  ;;  %v1842_v8 = vpack.c.bf16 %v559_v62, %v560_v63  ;;  %vm2994_vm7 = vmpackc.low %vm2535_vm5, %vm1994_vm3 }
  0x80   : > { %2019 = vmatpush3.bf16.msra.mxu0 %v2322_v19  ;;  %v538_v9 = vrot.slane %v2825_v58, 7  ;;  %v633_v10 = vsel %vm3517_vm1, %v624_v59, %v625_v61  ;;  %v307_v19 = vadd.s32 120, %v2757_v14  ;;  %vm2006_vm9 = vcmp.ne.s32.totalorder %v403_v3, 15 }
  0x81   : > { %2020 = vmatprep.subr.bf16.mxu0 %v2323_v23  ;;  %v635_v46 = vsel %vm3517_vm1, %v622_v33, %v623_v36  ;;  %vm3020_vm3 = vmpackc.low %vm2006_vm9, %vm2535_vm5  ;;  %v3567_v37 = vmov 0  ;;  %v3571_v50 = vmov 0  ;;  %v542_v53 = vrot.slane %v2883_v20, 7 }
  0x82   : > { %2179 = vmatpush3.bf16.msra.mxu1 %v2324_v21  ;;  %v375_v21 = vand.u32 15, %v301_v1  ;;  %v626_v1 = vrot.slane %v2952_v56, 1  ;;  %v558_v27 = vsel %vm548_vm0, %v537_v35, %v538_v9  ;;  %v713_v62 = vpack.c.bf16 %v2952_v56, %v2927_v41 }
  0x83   : > { %2180 = vmatprep.subr.bf16.mxu1 %v2327_v26  ;;  %v544_v63 = vrot.slane %v2927_v41, 7  ;;  %v716_v41 = vpack.c.bf16 %v2772_v30, %v2947_v52 }
  0x84   : > { %2021 = vmatpush3.bf16.msra.mxu0 %v2325_v24  ;;  %v1874_v24 = vpack.c.bf16 %v639_v18, %v640_v13  ;;  %vm2942_vm14 = vcmp.ne.s32.totalorder %v375_v21, 15  ;;  %v634_v13 = vsel %vm3517_vm1, %v623_v36, %v624_v59  ;;  %v632_v58 = vsel %vm3517_vm1, %v625_v61, %v626_v1 }
  0x85   : > { %2022 = vmatprep.subr.bf16.mxu0 %v2326_v34  ;;  %v303_v34 = vadd.s32 88, %v2757_v14  ;;  %vm2972_vm2 = vmpackc.low %vm2942_vm14, %vm2535_vm5  ;;  %v1886_v21 = vpack.c.bf16 %v633_v10, %v634_v13  ;;  %vm1995_vm14 = vcmp.ne.s32.totalorder %v354_v5, 0  ;;  %v304_v59 = vadd.s32 96, %v2757_v14 }
  0x86   : > { %2181 = vmatpush3.bf16.msra.mxu1 %v2327_v26  ;;  %v621_v26 = vrot.slane %v2863_v12, 1 }
  0x87   : > { %2182 = vmatprep.subr.bf16.mxu1 %v2329_v51  ;;  %v389_v47 = vand.u32 15, %v303_v34 }
  0x88   : > { %2023 = vmatpush3.bf16.msra.mxu0 %v2328_v49  ;;  %v637_v43 = vsel %vm3517_vm1, %v620_v25, %v621_v26  ;;  %v636_v49 = vsel %vm3517_vm1, %v621_v26, %v622_v33  ;;  %v628_v25 = vrot.slane %v2772_v30, 1  ;;  %v417_v33 = vand.u32 15, %v307_v19  ;;  %v2332_v30 = vld [vmem:[#allocation7 + $0x90] sm:$0xff]  }
  0x89   : > { %2200 = vmatprep.subr.bf16.mxu0 %v2330_v22  ;;  %v1878_v54 = vpack.c.bf16 %v637_v43, %v638_v44  ;;  %v1882_v57 = vpack.c.bf16 %v635_v46, %v636_v49  ;;  %vm2982_vm4 = vcmp.ne.s32.totalorder %v389_v47, 15  ;;  %v707_v43 = vpack.c.bf16 %v2874_v16, %v2863_v12  ;;  %v2336_v19 = vld [vmem:[#allocation7 + $0xb0] sm:$0xff]  }
  0x8a   : > { %2183 = vmatpush3.bf16.msra.mxu1 %v2329_v51  ;;  %vm3010_vm10 = vmpackc.low %vm2982_vm4, %vm2535_vm5  ;;  %v645_v35 = vsel %vm3517_vm1, %v628_v25, %v613_v40  ;;  %v540_v44 = vrot.slane %v2863_v12, 7  ;;  %vm2007_vm9 = vcmp.ne.s32.totalorder %v417_v33, 15  ;;  %v302_v12 = vadd.s32 80, %v2757_v14  ;;  %v2343_v33 = vld [vmem:[#allocation7 + $0x10] sm:$0xff]  }
  0x8b   : > { %1835 = vmatmul.mubr.msk.bf16.vlgmr.msra.gmra.mrb[0].mxu0 %vm2850_vm8, %v1834_v2  ;;  %v627_v2 = vrot.slane %v2947_v52, 1  ;;  %vm3035_vm4 = vmpackc.low %vm2535_vm5, %vm1995_vm14  ;;  %v710_v51 = vpack.c.bf16 %v2924_v39, %v2883_v20  ;;  %v3573_v20 = vmov 0 }
  0x8c   : > { %957 = vmatprep.mubr.bf16.mxu0 %v698_v7  ;;  %2201 = vmatpush3.bf16.msra.mxu0 %v2330_v22  ;;  %v300_v22 = vadd.s32 64, %v2757_v14  ;;  %v3568_v37 = vsel %vm3035_vm4, 4294967295, %v3567_v37  ;;  %v382_v55 = vand.u32 15, %v302_v12  ;;  %v546_v7 = vrot.slane %v2947_v52, 7  ;;  %v2331_v52 = vld [vmem:[#allocation7 + $0x88] sm:$0xff]  }
  0x8d   : > { %2185 = vmatmul.mubr.msk.bf16.vlgmr.msra.gmra.mrb[0].mxu1 %vm2890_vm11, %v1870_v17  ;;  %v539_v17 = vrot.slane %v2860_v11, 7  ;;  %v631_v18 = vsel %vm3517_vm1, %v626_v1, %v627_v2  ;;  %v630_v36 = vsel %vm3517_vm1, %v627_v2, %v628_v25  ;;  %vm3046_vm1 = vmpackc.low %vm2007_vm9, %vm2535_vm5  ;;  %v396_v1 = vand.u32 15, %v304_v59  ;;  %2202 = vmatprep.subr.bf16.mxu0 %v2331_v52  ;;  %v2340_v25 = vld [vmem:[#allocation7 + $0x48] sm:$0xff]  }
  0x8e   : > { %2188 = vmatprep.mubr.msk.bf16.mxu1 %vm2905_vm12, %v1874_v24  ;;  %v1890_v24 = vpack.c.bf16 %v631_v18, %v632_v58  ;;  %v1894_v46 = vpack.c.bf16 %v645_v35, %v630_v36  ;;  %vm1997_vm9 = vcmp.ne.s32.totalorder %v382_v55, 0  ;;  %v2334_v18 = vld [vmem:[#allocation7 + $0xa0] sm:$0xff]   ;;  %v2335_v58 = vld [vmem:[#allocation7 + $0xa8] sm:$0xff]   ;;  %v2345_v36 = vld [vmem:[#allocation7 + $0x18] sm:$0xff]  }
  0x8f   : > { %v557_v26 = vsel %vm548_vm0, %v538_v9, %v539_v17  ;;  %v549_v9 = vsel %vm548_vm0, %v546_v7, %v547_v38  ;;  %v2333_v38 = vld [vmem:[#allocation7 + $0x98] sm:$0xff]   ;;  %v2346_v35 = vld [vmem:[#allocation7 + $0x60] sm:$0xff]  }
  0x90   : > { %v1846_v34 = vpack.c.bf16 %v557_v26, %v558_v27  ;;  %2203 = vmatpush3.bf16.msra.mxu0 %v2331_v52  ;;  %v2341_v26 = vld [vmem:[#allocation7 + $0x8] sm:$0xff]   ;;  %v2342_v27 = vld [vmem:[#allocation7 + $0x50] sm:$0xff]  }
  0x91   : > { %2204 = vmatprep.subr.bf16.mxu0 %v2332_v30 }
  0x93   : > { %1839 = vmatmul.mubr.msk.bf16.gmra.mrb[4].mxu0 %vm2914_vm13, %v1838_v42  ;;  %v541_v42 = vrot.slane %v2874_v16, 7  ;;  %v556_v16 = vsel %vm548_vm0, %v539_v17, %v540_v44 }
  0x94   : > { %965 = vmatprep.mubr.bf16.mxu0 %v701_v45  ;;  %v368_v45 = vand.u32 15, %v300_v22  ;;  %2205 = vmatpush3.bf16.msra.mxu0 %v2332_v30  ;;  %v2338_v22 = vld [vmem:[#allocation7 + $0x40] sm:$0xff]  }
  0x95   : > { %2189 = vmatmul.mubr.msk.bf16.gmra.mrb[4].mxu1 %vm2959_vm15, %v1878_v54  ;;  %v555_v40 = vsel %vm548_vm0, %v540_v44, %v541_v42  ;;  %v543_v54 = vrot.slane %v2924_v39, 7  ;;  %v545_v39 = vrot.slane %v2952_v56, 7  ;;  %2206 = vmatprep.subr.bf16.mxu0 %v2333_v38  ;;  %v2349_v44 = vld [vmem:[#allocation7 + $0x28] sm:$0xff]  }
  0x96   : > { %2192 = vmatprep.mubr.msk.bf16.mxu1 %vm2972_vm2, %v1882_v57  ;;  %vm1996_vm14 = vcmp.ne.s32.totalorder %v368_v45, 0  ;;  %v1850_v49 = vpack.c.bf16 %v555_v40, %v556_v16  ;;  %v554_v57 = vsel %vm548_vm0, %v541_v42, %v542_v53  ;;  %2088 = vmatprep.subr.bf16.mxu1 %v2338_v22  ;;  %v2347_v42 = vld [vmem:[#allocation7 + $0x20] sm:$0xff]   ;;  %v2350_v45 = vld [vmem:[#allocation7 + $0x70] sm:$0xff]   ;;  %v2352_v40 = vld [vmem:[#allocation7 + $0x78] sm:$0xff]  }
  0x97   : > { %v553_v47 = vsel %vm548_vm0, %v542_v53, %v543_v54  ;;  %v551_v2 = vsel %vm548_vm0, %v544_v63, %v545_v39  ;;  %v552_v3 = vsel %vm548_vm0, %v543_v54, %v544_v63  ;;  %v550_v10 = vsel %vm548_vm0, %v545_v39, %v546_v7  ;;  %v2353_v16 = vld [vmem:[#allocation7 + $0x38] sm:$0xff]  }
  0x98   : > { %v1854_v61 = vpack.c.bf16 %v553_v47, %v554_v57  ;;  %v1858_v5 = vpack.c.bf16 %v551_v2, %v552_v3  ;;  %v1862_v13 = vpack.c.bf16 %v549_v9, %v550_v10  ;;  %2207 = vmatpush3.bf16.msra.mxu0 %v2333_v38 }
  0x99   : > { %2208 = vmatprep.subr.bf16.mxu0 %v2334_v18 }
  0x9b   : > { %1843 = vmatmul.mubr.msk.bf16.gmra.mrb[8].mxu0 %vm2994_vm7, %v1842_v8 }
  0x9c   : > { %973 = vmatprep.mubr.bf16.mxu0 %v704_v4  ;;  %v306_v4 = vadd.s32 112, %v2757_v14  ;;  %2209 = vmatpush3.bf16.msra.mxu0 %v2334_v18 }
  0x9d   : > { %2193 = vmatmul.mubr.msk.bf16.gmra.mrb[8].mxu1 %vm3010_vm10, %v1886_v21  ;;  %2210 = vmatprep.subr.bf16.mxu0 %v2335_v58  ;;  %v2337_v21 = vld [vmem:[#allocation7 + $0xb8] sm:$0xff]  }
  0x9e   : > { %2196 = vmatprep.mubr.msk.bf16.mxu1 %vm3020_vm3, %v1890_v24  ;;  %v410_v8 = vand.u32 15, %v306_v4  ;;  %v2339_v24 = vld [vmem:[#allocation7] sm:$0xff]  }
  0x9f   : > { %2089 = vmatpush3.bf16.msra.mxu1 %v2339_v24 }
  0xa0   : > { %2211 = vmatpush3.bf16.msra.mxu0 %v2335_v58  ;;  %2090 = vmatprep.subr.bf16.mxu1 %v2340_v25 }
  0xa1   : > { %2212 = vmatprep.subr.bf16.mxu0 %v2336_v19 }
  0xa3   : > { %1847 = vmatmul.mubr.msk.bf16.gmra.mrb[12].mxu0 %vm3035_vm4, %v1846_v34  ;;  %vm3058_vm4 = vmpackc.low %vm2535_vm5, %vm1996_vm14  ;;  %2091 = vmatpush3.bf16.msra.mxu1 %v2341_v26  ;;  %v2344_v34 = vld [vmem:[#allocation7 + $0x58] sm:$0xff]  }
  0xa4   : > { %981 = vmatprep.mubr.bf16.mxu0 %v707_v43  ;;  %v3572_v50 = vsel %vm3058_vm4, 4294967295, %v3571_v50  ;;  %vm3074_vm14 = vmpackc.low %vm2535_vm5, %vm1997_vm9  ;;  %vm1998_vm9 = vcmp.ne.s32.totalorder %v396_v1, 0  ;;  %2213 = vmatpush3.bf16.msra.mxu0 %v2336_v19  ;;  %v2348_v43 = vld [vmem:[#allocation7 + $0x68] sm:$0xff]  }
  0xa5   : > { %2197 = vmatmul.mubr.msk.bf16.gmra.mrb[12].mxu1 %vm3046_vm1, %v1894_v46  ;;  %v3574_v20 = vsel %vm3074_vm14, 4294967295, %v3573_v20  ;;  %2214 = vmatprep.subr.bf16.mxu0 %v2337_v21  ;;  %v2351_v46 = vld [vmem:[#allocation7 + $0x30] sm:$0xff]  }
  0xa6   : > { %2092 = vmatprep.subr.bf16.mxu1 %v2342_v27 }
  0xa7   : > { %2093 = vmatpush3.bf16.msra.mxu1 %v2343_v33 }
  0xa8   : > { %2215 = vmatpush3.bf16.msra.mxu0 %v2337_v21  ;;  %2094 = vmatprep.subr.bf16.mxu1 %v2344_v34 }
  0xab   : > { %1851 = vmatmul.mubr.msk.bf16.gmra.mrb[16].mxu0 %vm3058_vm4, %v1850_v49  ;;  %vm3090_vm4 = vmpackc.low %vm2535_vm5, %vm1998_vm9  ;;  %vm1999_vm9 = vcmp.ne.s32.totalorder %v410_v8, 0  ;;  %2095 = vmatpush3.bf16.msra.mxu1 %v2345_v36 }
  0xac   : > { %989 = vmatprep.mubr.bf16.mxu0 %v710_v51  ;;  %2096 = vmatprep.subr.bf16.mxu1 %v2346_v35  ;;  %v3115_v51 = vld [vmem:[%s3510_s2] ss:$0 sm:$0xff] }
  0xaf   : > { %2097 = vmatpush3.bf16.msra.mxu1 %v2347_v42 }
  0xb0   : > { %2098 = vmatprep.subr.bf16.mxu1 %v2348_v43 }
  0xb3   : > { %1855 = vmatmul.mubr.msk.bf16.gmra.mrb[20].mxu0 %vm3074_vm14, %v1854_v61  ;;  %vm3106_vm14 = vmpackc.low %vm2535_vm5, %vm1999_vm9  ;;  %2099 = vmatpush3.bf16.msra.mxu1 %v2349_v44  ;;  %vm3579_vm5 = vcmp.lt.s32.totalorder %v2757_v14, 7 }
  0xb4   : > { %997 = vmatprep.mubr.bf16.mxu0 %v713_v62  ;;  %2100 = vmatprep.subr.bf16.mxu1 %v2350_v45  ;;  %vm3580_vm9 = vmmov %vm3579_vm5 }
  0xb7   : > { %2101 = vmatpush3.bf16.msra.mxu1 %v2351_v46 }
  0xb8   : > { %2102 = vmatprep.subr.bf16.mxu1 %v2352_v40 }
  0xbb   : > { %1859 = vmatmul.mubr.msk.bf16.gmra.mrb[24].mxu0 %vm3090_vm4, %v1858_v5  ;;  %2103 = vmatpush3.bf16.msra.mxu1 %v2353_v16 }
  0xbc   : > { %1005 = vmatprep.mubr.bf16.mxu0 %v716_v41 }
  0xc3   : > { %1863 = vmatmul.mubr.msk.bf16.gmra.mrb[28].mxu0 %vm3106_vm14, %v1862_v13 }
 0x15e   : > { %v2024_v12 = vpop.f32.mrb[0].mxu0 }
 0x15f   : > { %v2025_v49 = vpop.f32.mrb[1].mxu0 }
 0x160   : > { %v2026_v53 = vadd.f32 %v2025_v49, %v2024_v12  ;;  %v2027_v54 = vpop.f32.mrb[2].mxu0  ;;  %v2186_v47 = vpop.f32.mrb[0].mxu1 }
 0x161   : > { %v2028_v55 = vpop.f32.mrb[3].mxu0  ;;  %v1048_v61 = vpop.f32.mrb[1].mxu1 }
 0x162   : > { %v2029_v57 = vadd.f32 %v2028_v55, %v2027_v54  ;;  %v952_v59 = vadd.f32 %v2026_v53, %v3115_v51  ;;  %v2187_v39 = vpop.f32.mrb[2].mxu1 }
 0x163   : > { %v1051_v1 = vpop.f32.mrb[3].mxu1 }
 0x164   : > { %v1049_v62 = vadd.f32 %v1048_v61, %v952_v59  ;;  %v955_v63 = vadd.f32 %v2029_v57, %v3115_v51 }
 0x166   : > { %v3119_v2 = vmax.f32 %v1049_v62, 0.0  ;;  %v1052_v3 = vadd.f32 %v1051_v1, %v955_v63  ;;  %v2030_v4 = vpop.f32.mrb[4].mxu0 }
 0x167   : > { %v2031_v5 = vpop.f32.mrb[5].mxu0 }
 0x168   : > { %v1112_v41 = vmax.f32 %v1052_v3, 0.0  ;;  %v2032_v7 = vadd.f32 %v2031_v5, %v2030_v4  ;;  %v2033_v8 = vpop.f32.mrb[6].mxu0  ;;  %v1127_v9 = vrot.slane %v3119_v2, 7  ;;  %v1175_v10 = vrot.slane %v3119_v2, 1  ;;  %v3123_v52 = vpop.f32.mrb[4].mxu1 }
 0x169   : > { %v2034_v13 = vpop.f32.mrb[7].mxu0  ;;  %v1064_v19 = vpop.f32.mrb[5].mxu1 }
 0x16a   : > { %v1128_v30 = vrot.slane %v1112_v41, 7  ;;  %v1176_v38 = vrot.slane %v1112_v41, 1  ;;  %v960_v18 = vadd.f32 %v2032_v7, %v3115_v51  ;;  %v2035_v58 = vadd.f32 %v2034_v13, %v2033_v8  ;;  %v3127_v22 = vpop.f32.mrb[6].mxu1 }
 0x16b   : > { %v1224_v21 = vpack.c.bf16 %v1112_v41, %v3119_v2  ;;  %v1067_v27 = vpop.f32.mrb[7].mxu1 }
 0x16c   : > { %v3133_v24 = vsel %vm548_vm0, %v1127_v9, %v1128_v30  ;;  %v1057_v25 = vadd.f32 %v2186_v47, %v960_v18  ;;  %v963_v26 = vadd.f32 %v2035_v58, %v3115_v51  ;;  %v1205_v33 = vsel %vm3579_vm5, %v1175_v10, %v1176_v38 }
 0x16d   : > { %1478 = vmatprep.mubr.bf16.mxu1 %v1224_v21 }
 0x16e   : > { %v3140_v34 = vmax.f32 %v1057_v25, 0.0  ;;  %v1060_v36 = vadd.f32 %v2187_v39, %v963_v26  ;;  %v2036_v35 = vpop.f32.mrb[8].mxu0 }
 0x16f   : > { %v2037_v42 = vpop.f32.mrb[9].mxu0 }
 0x170   : > { %v1129_v43 = vrot.slane %v3140_v34, 7  ;;  %v1177_v44 = vrot.slane %v3140_v34, 1  ;;  %v3144_v45 = vmax.f32 %v1060_v36, 0.0  ;;  %v2038_v46 = vadd.f32 %v2037_v42, %v2036_v35  ;;  %v2039_v40 = vpop.f32.mrb[10].mxu0  ;;  %v3146_v12 = vpop.f32.mrb[8].mxu1 }
 0x171   : > { %v2040_v16 = vpop.f32.mrb[11].mxu0  ;;  %v1080_v47 = vpop.f32.mrb[9].mxu1 }
 0x172   : > { %v1130_v49 = vrot.slane %v3144_v45, 7  ;;  %v1178_v53 = vrot.slane %v3144_v45, 1  ;;  %v2041_v54 = vadd.f32 %v2040_v16, %v2039_v40  ;;  %v968_v55 = vadd.f32 %v2038_v46, %v3115_v51  ;;  %v3153_v59 = vpop.f32.mrb[10].mxu1 }
 0x173   : > { %v1204_v57 = vsel %vm3580_vm9, %v1176_v38, %v1177_v44  ;;  %v1227_v61 = vpack.c.bf16 %v3144_v45, %v3140_v34  ;;  %v3159_v39 = vsel %vm548_vm0, %v1128_v30, %v1129_v43  ;;  %v1083_v4 = vpop.f32.mrb[11].mxu1  ;;  %vm3581_vm9 = vmmov %vm3579_vm5 }
 0x174   : > { %v1065_v62 = vadd.f32 %v1064_v19, %v968_v55  ;;  %v1203_v63 = vsel %vm3579_vm5, %v1177_v44, %v1178_v53  ;;  %v971_v1 = vadd.f32 %v2041_v54, %v3115_v51  ;;  %v1955_v3 = vpack.c.bf16 %v1204_v57, %v1205_v33 }
 0x175   : > { %v3166_v5 = vsel %vm548_vm0, %v1129_v43, %v1130_v49 }
 0x176   : > { %v3168_v41 = vmax.f32 %v1065_v62, 0.0  ;;  %v1068_v7 = vadd.f32 %v1067_v27, %v971_v1  ;;  %2216 = vmatprep.mubr.msk.bf16.mxu0 %vm2830_vm6, %v1955_v3  ;;  %v2042_v8 = vpop.f32.mrb[12].mxu0  ;;  %v1927_v13 = vpack.c.bf16 %v3166_v5, %v3159_v39  ;;  %vm3582_vm6 = vmmov %vm3579_vm5  ;;  %v3387_v39 = vld [vmem:[%s3512_s4] ss:$0 sm:$0xff] }
 0x177   : > { %v2043_v30 = vpop.f32.mrb[13].mxu0 }
 0x178   : > { %v1131_v38 = vrot.slane %v3168_v41, 7  ;;  %v1179_v18 = vrot.slane %v3168_v41, 1  ;;  %v3176_v58 = vmax.f32 %v1068_v7, 0.0  ;;  %v2044_v19 = vadd.f32 %v2043_v30, %v2042_v8  ;;  %v2045_v21 = vpop.f32.mrb[14].mxu0  ;;  %v3178_v26 = vpop.f32.mrb[12].mxu1 }
 0x179   : > { %v2046_v25 = vpop.f32.mrb[15].mxu0  ;;  %v3185_v35 = vpop.f32.mrb[13].mxu1 }
 0x17a   : > { %v1202_v60 = vsel %vm3581_vm9, %v1178_v53, %v1179_v18  ;;  %v1132_v27 = vrot.slane %v3176_v58, 7  ;;  %v1180_v33 = vrot.slane %v3176_v58, 1  ;;  %v976_v36 = vadd.f32 %v2044_v19, %v3115_v51  ;;  %v3187_v44 = vpop.f32.mrb[14].mxu1  ;;  %vm3585_vm9 = vmmov %vm3579_vm5 }
 0x17b   : > { %v1959_v42 = vpack.c.bf16 %v1202_v60, %v1203_v63  ;;  %v2047_v43 = vadd.f32 %v2046_v25, %v2045_v21  ;;  %v1230_v46 = vpack.c.bf16 %v3176_v58, %v3168_v41  ;;  %v3193_v40 = vsel %vm548_vm0, %v1130_v49, %v1131_v38  ;;  %v3198_v54 = vpop.f32.mrb[15].mxu1 }
 0x17c   : > { %v1073_v16 = vadd.f32 %v3123_v52, %v976_v36  ;;  %v1201_v53 = vsel %vm3582_vm6, %v1179_v18, %v1180_v33  ;;  %v3202_v55 = vsel %vm548_vm0, %v1131_v38, %v1132_v27  ;;  %vm3587_vm6 = vmmov %vm3579_vm5 }
 0x17d   : > { %v979_v57 = vadd.f32 %v2047_v43, %v3115_v51  ;;  %2217 = vmatmul.mubr.msk.bf16.vlgmr.msra.gmra.mrb[32].mxu0 %vm2890_vm11, %v1959_v42  ;;  %v1931_v49 = vpack.c.bf16 %v3202_v55, %v3193_v40  ;;  %vm3583_vm11 = vmmov %vm3579_vm5 }
 0x17e   : > { %v3209_v62 = vmax.f32 %v1073_v16, 0.0  ;;  %v2048_v52 = vpop.f32.mrb[16].mxu0 }
 0x17f   : > { %v1076_v63 = vadd.f32 %v3127_v22, %v979_v57  ;;  %v2049_v1 = vpop.f32.mrb[17].mxu0 }
 0x180   : > { %v1133_v3 = vrot.slane %v3209_v62, 7  ;;  %v1181_v7 = vrot.slane %v3209_v62, 1  ;;  %v2050_v8 = vadd.f32 %v2049_v1, %v2048_v52  ;;  %v2051_v30 = vpop.f32.mrb[18].mxu0 }
 0x181   : > { %v3214_v38 = vmax.f32 %v1076_v63, 0.0  ;;  %v2052_v18 = vpop.f32.mrb[19].mxu0 }
 0x182   : > { %v2053_v23 = vadd.f32 %v2052_v18, %v2051_v30  ;;  %v984_v19 = vadd.f32 %v2050_v8, %v3115_v51  ;;  %v1200_v21 = vsel %vm3583_vm11, %v1180_v33, %v1181_v7  ;;  %v3221_v25 = vsel %vm548_vm0, %v1132_v27, %v1133_v3  ;;  %vm3588_vm11 = vmmov %vm3579_vm5 }
 0x183   : > { %v1134_v22 = vrot.slane %v3214_v38, 7  ;;  %v1182_v60 = vrot.slane %v3214_v38, 1  ;;  %v1963_v36 = vpack.c.bf16 %v1200_v21, %v1201_v53  ;;  %v3593_v14 = vpack.c.bf16 %v3214_v38, %v3209_v62 }
 0x184   : > { %v1081_v43 = vadd.f32 %v1080_v47, %v984_v19  ;;  %v987_v16 = vadd.f32 %v2053_v23, %v3115_v51 }
 0x185   : > { %2220 = vmatprep.mubr.msk.bf16.mxu0 %vm2905_vm12, %v1963_v36  ;;  %v1199_v33 = vsel %vm3579_vm5, %v1181_v7, %v1182_v60  ;;  %v3234_v27 = vsel %vm548_vm0, %v1133_v3, %v1134_v22  ;;  %vm3584_vm12 = vmmov %vm3579_vm5 }
 0x186   : > { %v3236_v57 = vmax.f32 %v1081_v43, 0.0  ;;  %v1084_v52 = vadd.f32 %v1083_v4, %v987_v16  ;;  %v2054_v53 = vpop.f32.mrb[20].mxu0  ;;  %v3594_v6 = vpack.c.bf16 %v3234_v27, %v3221_v25  ;;  %v2354_v27 = vld [vmem:[%s2747_s6] sm:$0xff] }
 0x187   : > { %v2055_v47 = vpop.f32.mrb[21].mxu0 }
 0x188   : > { %v1135_v1 = vrot.slane %v3236_v57, 7  ;;  %v1183_v32 = vrot.slane %v3236_v57, 1  ;;  %v3242_v8 = vmax.f32 %v1084_v52, 0.0  ;;  %v2056_v30 = vadd.f32 %v2055_v47, %v2054_v53  ;;  %v2057_v7 = vpop.f32.mrb[22].mxu0 }
 0x189   : > { %v2058_v18 = vpop.f32.mrb[23].mxu0 }
 0x18a   : > { %v1136_v3 = vrot.slane %v3242_v8, 7  ;;  %v1184_v23 = vrot.slane %v3242_v8, 1  ;;  %v992_v4 = vadd.f32 %v2056_v30, %v3115_v51  ;;  %v2059_v19 = vadd.f32 %v2058_v18, %v2057_v7 }
 0x18b   : > { %v1198_v21 = vsel %vm3584_vm12, %v1182_v60, %v1183_v32  ;;  %v3253_v43 = vsel %vm548_vm0, %v1134_v22, %v1135_v1  ;;  %v3596_v29 = vpack.c.bf16 %v3242_v8, %v3236_v57 }
 0x18c   : > { %v1089_v16 = vadd.f32 %v3146_v12, %v992_v4  ;;  %v995_v52 = vadd.f32 %v2059_v19, %v3115_v51  ;;  %v1967_v53 = vpack.c.bf16 %v1198_v21, %v1199_v33  ;;  %v1197_v47 = vsel %vm3585_vm9, %v1183_v32, %v1184_v23 }
 0x18d   : > { %v3261_v30 = vsel %vm548_vm0, %v1135_v1, %v1136_v3 }
 0x18e   : > { %v3263_v60 = vmax.f32 %v1089_v16, 0.0  ;;  %v1092_v7 = vadd.f32 %v3153_v59, %v995_v52  ;;  %2221 = vmatmul.mubr.msk.bf16.gmra.mrb[36].mxu0 %vm2959_vm15, %v1967_v53  ;;  %v2060_v22 = vpop.f32.mrb[24].mxu0  ;;  %vm3586_vm15 = vmmov %vm3579_vm5  ;;  %v3597_v31 = vpack.c.bf16 %v3261_v30, %v3253_v43 }
 0x18f   : > { %v2061_v18 = vpop.f32.mrb[25].mxu0 }
 0x190   : > { %v1137_v33 = vrot.slane %v3263_v60, 7  ;;  %v1185_v32 = vrot.slane %v3263_v60, 1  ;;  %v3272_v4 = vmax.f32 %v1092_v7, 0.0  ;;  %v2062_v1 = vadd.f32 %v2061_v18, %v2060_v22  ;;  %v2063_v19 = vpop.f32.mrb[26].mxu0 }
 0x191   : > { %v2064_v21 = vpop.f32.mrb[27].mxu0 }
 0x192   : > { %v1138_v16 = vrot.slane %v3272_v4, 7  ;;  %v1186_v59 = vrot.slane %v3272_v4, 1  ;;  %v2065_v48 = vadd.f32 %v2064_v21, %v2063_v19  ;;  %v1000_v52 = vadd.f32 %v2062_v1, %v3115_v51 }
 0x193   : > { %v1196_v53 = vsel %vm3586_vm15, %v1184_v23, %v1185_v32  ;;  %v1239_v12 = vpack.c.bf16 %v3272_v4, %v3263_v60  ;;  %v3283_v7 = vsel %vm548_vm0, %v1136_v3, %v1137_v33 }
 0x194   : > { %v1097_v22 = vadd.f32 %v3185_v35, %v1000_v52  ;;  %v1003_v18 = vadd.f32 %v2065_v48, %v3115_v51  ;;  %v1971_v36 = vpack.c.bf16 %v1196_v53, %v1197_v47  ;;  %v1195_v19 = vsel %vm3587_vm6, %v1185_v32, %v1186_v59 }
 0x195   : > { %v1147_v1 = vsel %vm548_vm0, %v1137_v33, %v1138_v16 }
 0x196   : > { %v1123_v21 = vmax.f32 %v1097_v22, 0.0  ;;  %v1100_v23 = vadd.f32 %v3198_v54, %v1003_v18  ;;  %2224 = vmatprep.mubr.msk.bf16.mxu0 %vm2972_vm2, %v1971_v36  ;;  %v2066_v60 = vpop.f32.mrb[28].mxu0  ;;  %v1943_v3 = vpack.c.bf16 %v1147_v1, %v3283_v7  ;;  %vm3589_vm2 = vmmov %vm3579_vm5 }
 0x197   : > { %v2067_v4 = vpop.f32.mrb[29].mxu0  ;;  %vm3590_vm5 = vmmov %vm3589_vm2 }
 0x198   : > { %v1139_v35 = vrot.slane %v1123_v21, 7  ;;  %v1187_v52 = vrot.slane %v1123_v21, 1  ;;  %v1124_v48 = vmax.f32 %v1100_v23, 0.0  ;;  %v2068_v47 = vadd.f32 %v2067_v4, %v2066_v60  ;;  %v2069_v53 = vpop.f32.mrb[30].mxu0  ;;  %vm3592_vm12 = vmmov %vm3589_vm2 }
 0x199   : > { %v2070_v63 = vpop.f32.mrb[31].mxu0 }
 0x19a   : > { %v1140_v32 = vrot.slane %v1124_v48, 7  ;;  %v1188_v42 = vrot.slane %v1124_v48, 1  ;;  %v1008_v33 = vadd.f32 %v2068_v47, %v3115_v51  ;;  %v2071_v22 = vadd.f32 %v2070_v63, %v2069_v53 }
 0x19b   : > { %v1194_v54 = vsel %vm3588_vm11, %v1186_v59, %v1187_v52  ;;  %v1242_v0 = vpack.c.bf16 %v1124_v48, %v1123_v21  ;;  %v1146_v36 = vsel %vm548_vm0, %v1138_v16, %v1139_v35 }
 0x19c   : > { %v1105_v7 = vadd.f32 %v3178_v26, %v1008_v33  ;;  %v1011_v18 = vadd.f32 %v2071_v22, %v3115_v51  ;;  %v1975_v1 = vpack.c.bf16 %v1194_v54, %v1195_v19  ;;  %v1193_v23 = vsel %vm3589_vm2, %v1187_v52, %v1188_v42 }
 0x19d   : > { %v1145_v60 = vsel %vm548_vm0, %v1139_v35, %v1140_v32 }
 0x19e   : > { %v1125_v4 = vmax.f32 %v1105_v7, 0.0  ;;  %v1108_v63 = vadd.f32 %v3187_v44, %v1011_v18  ;;  %2225 = vmatmul.mubr.msk.bf16.gmra.mrb[40].mxu0 %vm3010_vm10, %v1975_v1  ;;  %v1947_v59 = vpack.c.bf16 %v1145_v60, %v1146_v36  ;;  %vm3591_vm10 = vmmov %vm3589_vm2 }
 0x1a0   : > { %v1141_v21 = vrot.slane %v1125_v4, 7  ;;  %v1189_v16 = vrot.slane %v1125_v4, 1  ;;  %v1126_v48 = vmax.f32 %v1108_v63, 0.0  ;;  %v2356_v63 = vld [vmem:[%s2747_s6 + $0x10] sm:$0xff] }
 0x1a2   : > { %v1142_v26 = vrot.slane %v1126_v48, 7  ;;  %v1190_v47 = vrot.slane %v1126_v48, 1  ;;  %v1192_v51 = vsel %vm3590_vm5, %v1188_v42, %v1189_v16  ;;  %v1245_v19 = vpack.c.bf16 %v1126_v48, %v1125_v4 }
 0x1a3   : > { %v1979_v52 = vpack.c.bf16 %v1192_v51, %v1193_v23  ;;  %v1144_v35 = vsel %vm548_vm0, %v1140_v32, %v1141_v21 }
 0x1a4   : > { %v1158_v11 = vsel %vm548_vm0, %v1142_v26, %v1127_v9  ;;  %v1191_v44 = vsel %vm3591_vm10, %v1189_v16, %v1190_v47  ;;  %v1206_v53 = vsel %vm3592_vm12, %v1190_v47, %v1175_v10  ;;  %v1143_v42 = vsel %vm548_vm0, %v1141_v21, %v1142_v26  ;;  %v2357_v47 = vld [vmem:[%s2747_s6 + $0x18] sm:$0xff] }
 0x1a5   : > { %v1923_v33 = vpack.c.bf16 %v3133_v24, %v1158_v11  ;;  %2228 = vmatprep.mubr.msk.bf16.mxu0 %vm3020_vm3, %v1979_v52  ;;  %v1983_v32 = vpack.c.bf16 %v1206_v53, %v1191_v44  ;;  %v1951_v22 = vpack.c.bf16 %v1143_v42, %v1144_v35  ;;  %vm3595_vm0 = vnez %v3568_v37 }
 0x1a7   : > { %1924 = vmatmul.mubr.msk.bf16.vlgmr.msra.gmra.mrb[16].mxu1 %vm2850_vm8, %v1923_v33  ;;  %2229 = vmatmul.mubr.msk.bf16.gmra.mrb[44].mxu0 %vm3046_vm1, %v1983_v32  ;;  %vm3598_vm1 = vnez %v3572_v50  ;;  %vm3599_vm8 = vnez %v3574_v20  ;;  %v2358_v32 = vld [vmem:[%s2747_s6 + $0x20] sm:$0xff] }
 0x1a8   : > { %1486 = vmatprep.mubr.bf16.mxu1 %v1227_v61 }
 0x1af   : > { %1928 = vmatmul.mubr.msk.bf16.gmra.mrb[20].mxu1 %vm2914_vm13, %v1927_v13 }
 0x1b0   : > { %1494 = vmatprep.mubr.bf16.mxu1 %v1230_v46 }
 0x1b7   : > { %1932 = vmatmul.mubr.msk.bf16.gmra.mrb[24].mxu1 %vm2994_vm7, %v1931_v49 }
 0x1b8   : > { %1502 = vmatprep.mubr.bf16.mxu1 %v3593_v14 }
 0x1bf   : > { %1936 = vmatmul.mubr.msk.bf16.gmra.mrb[28].mxu1 %vm3595_vm0, %v3594_v6 }
 0x1c0   : > { %1510 = vmatprep.mubr.bf16.mxu1 %v3596_v29 }
 0x1c7   : > { %1940 = vmatmul.mubr.msk.bf16.gmra.mrb[32].mxu1 %vm3598_vm1, %v3597_v31 }
 0x1c8   : > { %1518 = vmatprep.mubr.bf16.mxu1 %v1239_v12 }
 0x1cf   : > { %1944 = vmatmul.mubr.msk.bf16.gmra.mrb[36].mxu1 %vm3599_vm8, %v1943_v3  ;;  %v2355_v3 = vld [vmem:[%s2747_s6 + $0x8] sm:$0xff] }
 0x1d0   : > { %1526 = vmatprep.mubr.bf16.mxu1 %v1242_v0 }
 0x1d7   : > { %1948 = vmatmul.mubr.msk.bf16.gmra.mrb[40].mxu1 %vm3090_vm4, %v1947_v59 }
 0x1d8   : > { %1534 = vmatprep.mubr.bf16.mxu1 %v1245_v19 }
 0x1df   : > { %1952 = vmatmul.mubr.msk.bf16.gmra.mrb[44].mxu1 %vm3106_vm14, %v1951_v22 }
 0x250   : > { %v2218_v15 = vpop.f32.mrb[32].mxu0 }
 0x251   : > { %v1577_v37 = vpop.f32.mrb[33].mxu0 }
 0x252   : > { %v2219_v28 = vpop.f32.mrb[34].mxu0 }
 0x253   : > { %v1580_v2 = vpop.f32.mrb[35].mxu0 }
 0x261   : > { %v3370_v9 = vpop.f32.mrb[36].mxu0 }
 0x262   : > { %v1593_v50 = vpop.f32.mrb[37].mxu0 }
 0x263   : > { %v3372_v10 = vpop.f32.mrb[38].mxu0 }
 0x264   : > { %v1596_v24 = vpop.f32.mrb[39].mxu0 }
 0x271   : > { %v3374_v20 = vpop.f32.mrb[40].mxu0 }
 0x272   : > { %v3376_v34 = vpop.f32.mrb[41].mxu0 }
 0x273   : > { %v3378_v56 = vpop.f32.mrb[42].mxu0 }
 0x274   : > { %v3380_v45 = vpop.f32.mrb[43].mxu0 }
 0x27a   : > { %v2104_v17 = vpop.f32.mrb[16].mxu1  ;;  %v3382_v61 = vpop.f32.mrb[44].mxu0 }
 0x27b   : > { %v2105_v5 = vpop.f32.mrb[17].mxu1  ;;  %v3389_v41 = vpop.f32.mrb[45].mxu0 }
 0x27c   : > { %v2106_v13 = vadd.f32 %v2105_v5, %v2104_v17  ;;  %v2107_v58 = vpop.f32.mrb[18].mxu1  ;;  %v3391_v46 = vpop.f32.mrb[46].mxu0 }
 0x27d   : > { %v2108_v40 = vpop.f32.mrb[19].mxu1  ;;  %v3393_v55 = vpop.f32.mrb[47].mxu0 }
 0x27e   : > { %v1481_v49 = vadd.f32 %v2106_v13, %v3387_v39  ;;  %v2109_v62 = vadd.f32 %v2108_v40, %v2107_v58  ;;  %v2360_v40 = vld [vmem:[%s2747_s6 + $0x30] sm:$0xff] }
 0x280   : > { %v1578_v38 = vadd.f32 %v1577_v37, %v1481_v49  ;;  %v1484_v25 = vadd.f32 %v2109_v62, %v3387_v39 }
 0x282   : > { %v1640_v57 = vadd.f32 %v2354_v27, %v1578_v38  ;;  %v1581_v8 = vadd.f32 %v1580_v2, %v1484_v25  ;;  %v2110_v43 = vpop.f32.mrb[20].mxu1 }
 0x283   : > { %v2111_v30 = vpop.f32.mrb[21].mxu1 }
 0x284   : > { %v1656_v12 = vmax.f32 %v1640_v57, 0.0  ;;  %v1641_v54 = vadd.f32 %v2355_v3, %v1581_v8  ;;  %v2112_v0 = vadd.f32 %v2111_v30, %v2110_v43  ;;  %v2113_v36 = vpop.f32.mrb[22].mxu1  ;;  %v2361_v57 = vld [vmem:[%s2747_s6 + $0x38] sm:$0xff] }
 0x285   : > { %v2114_v7 = vpop.f32.mrb[23].mxu1 }
 0x286   : > { %1672 = vst [vmem:[%s3401_s11] sm:$0xff] %v1656_v12  ;;  %v1657_v18 = vmax.f32 %v1641_v54, 0.0  ;;  %v1489_v1 = vadd.f32 %v2112_v0, %v3387_v39  ;;  %v2115_v23 = vadd.f32 %v2114_v7, %v2113_v36  ;;  %v2362_v36 = vld [vmem:[%s2747_s6 + $0x40] sm:$0xff] }
 0x288   : > { %1673 = vst [vmem:[%s3401_s11 + $0x8] sm:$0xff] %v1657_v18  ;;  %v1586_v60 = vadd.f32 %v2218_v15, %v1489_v1  ;;  %v1492_v4 = vadd.f32 %v2115_v23, %v3387_v39  ;;  %v2359_v15 = vld [vmem:[%s2747_s6 + $0x28] sm:$0xff] }
 0x28a   : > { %v1642_v59 = vadd.f32 %v2356_v63, %v1586_v60  ;;  %v1589_v21 = vadd.f32 %v2219_v28, %v1492_v4  ;;  %v2116_v16 = vpop.f32.mrb[24].mxu1  ;;  %v2363_v4 = vld [vmem:[%s2747_s6 + $0x48] sm:$0xff] }
 0x28b   : > { %v2117_v48 = vpop.f32.mrb[25].mxu1 }
 0x28c   : > { %v1658_v26 = vmax.f32 %v1642_v59, 0.0  ;;  %v1643_v51 = vadd.f32 %v2357_v47, %v1589_v21  ;;  %v2118_v19 = vadd.f32 %v2117_v48, %v2116_v16  ;;  %v2119_v52 = vpop.f32.mrb[26].mxu1 }
 0x28d   : > { %v2120_v35 = vpop.f32.mrb[27].mxu1 }
 0x28e   : > { %1674 = vst [vmem:[%s3401_s11 + $0x10] sm:$0xff] %v1658_v26  ;;  %v1659_v11 = vmax.f32 %v1643_v51, 0.0  ;;  %v1497_v44 = vadd.f32 %v2118_v19, %v3387_v39  ;;  %v2121_v53 = vadd.f32 %v2120_v35, %v2119_v52  ;;  %v2364_v51 = vld [vmem:[%s2747_s6 + $0x50] sm:$0xff] }
 0x290   : > { %1675 = vst [vmem:[%s3401_s11 + $0x18] sm:$0xff] %v1659_v11  ;;  %v1594_v42 = vadd.f32 %v1593_v50, %v1497_v44  ;;  %v1500_v33 = vadd.f32 %v2121_v53, %v3387_v39  ;;  %v2365_v53 = vld [vmem:[%s2747_s6 + $0x58] sm:$0xff] }
 0x292   : > { %v1644_v22 = vadd.f32 %v2358_v32, %v1594_v42  ;;  %v1597_v14 = vadd.f32 %v1596_v24, %v1500_v33  ;;  %v2122_v6 = vpop.f32.mrb[28].mxu1 }
 0x293   : > { %v2123_v29 = vpop.f32.mrb[29].mxu1 }
 0x294   : > { %v1660_v31 = vmax.f32 %v1644_v22, 0.0  ;;  %v1645_v37 = vadd.f32 %v2359_v15, %v1597_v14  ;;  %v2124_v28 = vadd.f32 %v2123_v29, %v2122_v6  ;;  %v2125_v2 = vpop.f32.mrb[30].mxu1 }
 0x295   : > { %v2126_v17 = vpop.f32.mrb[31].mxu1 }
 0x296   : > { %1676 = vst [vmem:[%s3401_s11 + $0x20] sm:$0xff] %v1660_v31  ;;  %v1661_v5 = vmax.f32 %v1645_v37, 0.0  ;;  %v1505_v50 = vadd.f32 %v2124_v28, %v3387_v39  ;;  %v2127_v13 = vadd.f32 %v2126_v17, %v2125_v2  ;;  %v2366_v31 = vld [vmem:[%s2747_s6 + $0x60] sm:$0xff] }
 0x298   : > { %1677 = vst [vmem:[%s3401_s11 + $0x28] sm:$0xff] %v1661_v5  ;;  %v1602_v58 = vadd.f32 %v3370_v9, %v1505_v50  ;;  %v1508_v24 = vadd.f32 %v2127_v13, %v3387_v39  ;;  %v2367_v5 = vld [vmem:[%s2747_s6 + $0x68] sm:$0xff] }
 0x29a   : > { %v1646_v49 = vadd.f32 %v2360_v40, %v1602_v58  ;;  %v1605_v62 = vadd.f32 %v3372_v10, %v1508_v24  ;;  %v2128_v38 = vpop.f32.mrb[32].mxu1 }
 0x29b   : > { %v2129_v25 = vpop.f32.mrb[33].mxu1 }
 0x29c   : > { %v1662_v27 = vmax.f32 %v1646_v49, 0.0  ;;  %v1647_v8 = vadd.f32 %v2361_v57, %v1605_v62  ;;  %v2130_v43 = vadd.f32 %v2129_v25, %v2128_v38  ;;  %v2131_v30 = vpop.f32.mrb[34].mxu1  ;;  %v2368_v38 = vld [vmem:[%s2747_s6 + $0x70] sm:$0xff] }
 0x29d   : > { %v2132_v12 = vpop.f32.mrb[35].mxu1 }
 0x29e   : > { %1678 = vst [vmem:[%s3401_s11 + $0x30] sm:$0xff] %v1662_v27  ;;  %v1663_v3 = vmax.f32 %v1647_v8, 0.0  ;;  %v1513_v9 = vadd.f32 %v2130_v43, %v3387_v39  ;;  %v2133_v54 = vadd.f32 %v2132_v12, %v2131_v30  ;;  %v2369_v8 = vld [vmem:[%s2747_s6 + $0x78] sm:$0xff] }
 0x2a0   : > { %1679 = vst [vmem:[%s3401_s11 + $0x38] sm:$0xff] %v1663_v3  ;;  %v1610_v0 = vadd.f32 %v3376_v34, %v1513_v9  ;;  %v1516_v10 = vadd.f32 %v2133_v54, %v3387_v39 }
 0x2a2   : > { %v1648_v7 = vadd.f32 %v2362_v36, %v1610_v0  ;;  %v1613_v18 = vadd.f32 %v3380_v45, %v1516_v10  ;;  %v2134_v1 = vpop.f32.mrb[36].mxu1 }
 0x2a3   : > { %v2135_v23 = vpop.f32.mrb[37].mxu1 }
 0x2a4   : > { %v1664_v60 = vmax.f32 %v1648_v7, 0.0  ;;  %v1649_v63 = vadd.f32 %v2363_v4, %v1613_v18  ;;  %v2136_v59 = vadd.f32 %v2135_v23, %v2134_v1  ;;  %v2137_v21 = vpop.f32.mrb[38].mxu1 }
 0x2a5   : > { %v2138_v16 = vpop.f32.mrb[39].mxu1 }
 0x2a6   : > { %1680 = vst [vmem:[%s3401_s11 + $0x40] sm:$0xff] %v1664_v60  ;;  %v1665_v48 = vmax.f32 %v1649_v63, 0.0  ;;  %v1521_v34 = vadd.f32 %v2136_v59, %v3387_v39  ;;  %v2139_v26 = vadd.f32 %v2138_v16, %v2137_v21 }
 0x2a8   : > { %1681 = vst [vmem:[%s3401_s11 + $0x48] sm:$0xff] %v1665_v48  ;;  %v1618_v47 = vadd.f32 %v3374_v20, %v1521_v34  ;;  %v1524_v45 = vadd.f32 %v2139_v26, %v3387_v39 }
 0x2aa   : > { %v1650_v19 = vadd.f32 %v2364_v51, %v1618_v47  ;;  %v1621_v52 = vadd.f32 %v3378_v56, %v1524_v45  ;;  %v2140_v35 = vpop.f32.mrb[40].mxu1 }
 0x2ab   : > { %v2141_v11 = vpop.f32.mrb[41].mxu1 }
 0x2ac   : > { %v1666_v44 = vmax.f32 %v1650_v19, 0.0  ;;  %v1651_v42 = vadd.f32 %v2365_v53, %v1621_v52  ;;  %v2142_v33 = vadd.f32 %v2141_v11, %v2140_v35  ;;  %v2143_v32 = vpop.f32.mrb[42].mxu1 }
 0x2ad   : > { %v2144_v22 = vpop.f32.mrb[43].mxu1 }
 0x2ae   : > { %1682 = vst [vmem:[%s3401_s11 + $0x50] sm:$0xff] %v1666_v44  ;;  %v1667_v14 = vmax.f32 %v1651_v42, 0.0  ;;  %v1529_v20 = vadd.f32 %v2142_v33, %v3387_v39  ;;  %v2145_v6 = vadd.f32 %v2144_v22, %v2143_v32 }
 0x2b0   : > { %1683 = vst [vmem:[%s3401_s11 + $0x58] sm:$0xff] %v1667_v14  ;;  %v1626_v29 = vadd.f32 %v3389_v41, %v1529_v20  ;;  %v1532_v56 = vadd.f32 %v2145_v6, %v3387_v39 }
 0x2b2   : > { %v1652_v15 = vadd.f32 %v2366_v31, %v1626_v29  ;;  %v1629_v37 = vadd.f32 %v3393_v55, %v1532_v56  ;;  %v2146_v28 = vpop.f32.mrb[44].mxu1 }
 0x2b3   : > { %v2147_v2 = vpop.f32.mrb[45].mxu1 }
 0x2b4   : > { %v1668_v17 = vmax.f32 %v1652_v15, 0.0  ;;  %v1653_v50 = vadd.f32 %v2367_v5, %v1629_v37  ;;  %v2148_v13 = vadd.f32 %v2147_v2, %v2146_v28  ;;  %v2149_v58 = vpop.f32.mrb[46].mxu1 }
 0x2b5   : > { %v2150_v24 = vpop.f32.mrb[47].mxu1 }
 0x2b6   : > { %1684 = vst [vmem:[%s3401_s11 + $0x60] sm:$0xff] %v1668_v17  ;;  %v1669_v41 = vmax.f32 %v1653_v50, 0.0  ;;  %v1537_v40 = vadd.f32 %v2148_v13, %v3387_v39  ;;  %v2151_v49 = vadd.f32 %v2150_v24, %v2149_v58 }
 0x2b8   : > { %1685 = vst [vmem:[%s3401_s11 + $0x68] sm:$0xff] %v1669_v41  ;;  %v1634_v55 = vadd.f32 %v3382_v61, %v1537_v40  ;;  %v1540_v62 = vadd.f32 %v2151_v49, %v3387_v39 }
 0x2ba   : > { %v1654_v25 = vadd.f32 %v2368_v38, %v1634_v55  ;;  %v1637_v27 = vadd.f32 %v3391_v46, %v1540_v62 }
 0x2bc   : > { %v1670_v57 = vmax.f32 %v1654_v25, 0.0  ;;  %v1655_v43 = vadd.f32 %v2369_v8, %v1637_v27 }
 0x2be   : > { %1686 = vst [vmem:[%s3401_s11 + $0x70] sm:$0xff] %v1670_v57  ;;  %v1671_v61 = vmax.f32 %v1655_v43, 0.0 }
 0x2c0   : > { %1687 = vst [vmem:[%s3401_s11 + $0x78] sm:$0xff] %v1671_v61 }
 0x2c1   : > { %2469 = shalt.err (!%p2466_p2)
}
 0x2c2   : > { %s2470_s6 = scalar_lea.hbm %s3460_s9, 2048  ;;  %s2474_s8 = scalar_lea.hbm %s3513_s5, 4096 }
 0x2c3   : > { %p2471_p13 = scmp.ne.s32.totalorder %s3460_s9, %s2470_s6  ;;  %p2475_p4 = scmp.lt.u32.totalorder %s3460_s9, %s3513_s5 }
 0x2c4   : > { %p2476_p5 = scmp.lt.u32.totalorder %s2474_s8, %s2470_s6  ;;  %p2478_p11 = scmp.lt.u32.totalorder %s2470_s6, %s3460_s9 }
 0x2c5   : > { %p2472_p6 = pnand %p2471_p13, %p3600_p0 }
 0x2c6   : > { %p2477_p8 = por %p2476_p5, %p2475_p4 }
 0x2c7   : > { %p2473_p10 = pneg %p2472_p6 }
 0x2c8   : > { %p2479_p1 = por %p2478_p11, %p2477_p8 }
 0x2ca   : > { %p2480_p3 = pnand %p2479_p1, %p2473_p10 }
 0x2cc   : > { %2483 = shalt.err (!%p2480_p3)
}
 0x2cd   : > { %s2537_s28 = smov 128   ;;  %s2538_s15 = smov 8  }
 0x2ce   : > { %2242 = dma.vmem_to_hbm [thread:$0]  (%p3600_p0), %s3462_s30, 2048, %s3460_s9, %s1689_s12, %s2537_s28, %s2537_s28, %s2538_s15  }
 0x2cf PF: > { %s1717_s16 = sand.u32 1, %s2514_s18   ;;  %p3601_p7 = scmp.ne.s32.totalorder %s3522_s25, 0 }
 0x2d0   : > { %p3602_p9 = scmp.ge.s32.totalorder %s2526_s21, 2  ;;  %s1718_s13 = scalar_lea.sflag [#allocation4], %s1717_s16 }
 0x2d2   : > { %p2256_p12 = pnand %p3602_p9, %p3601_p7 }
 0x2d4   : > { %2509 = dma.done.wait (!%p2256_p12), %s1718_s13, 2048  }
 0x2d5   : > { %2511 = vsyncadd (!%p2256_p12), %s1718_s13, 4294965248  ;;  %p19_p2 = scmp.ge.s32.totalorder %s2679_s14, 4   ;;  %s3603_s18 = smov %s2518_s19 }
 0x2d6   : > { %s3604_s19 = smov %s2522_s20  ;;  %s3605_s20 = smov %s2695_s27 }
 0x2d7   : > { %s3606_s21 = smov %s2679_s14  ;;  %21 = sbr.rel (!%p19_p2) target bundleno = 6 (0x6), region = 93 }
 0x2de   :  { %1723 = vsyncpa [#allocation3], 1 }
 0x2df   :  { %1725 = vsyncpa [#allocation3 + $0x1], 1 }
 0x2e0   :  { %1726 = vsyncpa [#allocation6], 1 }
 0x2e1   :  { %1727 = vsyncpa [#allocation4], 1 }
 0x2e2   :  { %1729 = vsyncpa [#allocation4 + $0x1], 1 }

</bundles_post_ra>
